<compile_context>
chip_gen: v5e
topology: v5e:2x2
jax: 0.10.0
libtpu: 0.0.40
codegen_flags: <defaults>
</compile_context>

<pallas_src>
import functools

import jax
import jax.numpy as jnp
import numpy as np
from jax.experimental import pallas as pl
from jax.experimental.pallas import tpu as pltpu


# ----------------------------------------------------------------------------
# Pallas kernel: BB batch elements per grid step (BB == B at demo shapes).
# ----------------------------------------------------------------------------
def _cvt_kernel(wp_ref, seg_ref, oh_ref, wenc_ref, benc_ref, wdec_ref, bdec_ref,
                logits_ref, loss_ref, *, HP, NP, BB):
    # ---- fused bi-directional encoder: one (BB*T, E+P) @ (E+P, 2*HP) dot ----
    z = jnp.dot(wp_ref[...], wenc_ref[...], preferred_element_type=jnp.float32)
    z = jnp.tanh(z + benc_ref[...])                   # f32 activations (EUP)
    # fwd/bwd halves meet at lane HP (=128k) -> vreg-boundary slice, no shuffle
    enc = z[:, :HP] + z[:, HP:]                       # (BB*T, HP)

    # ---- masked, length-normalised pooling on the MXU ------------------------
    # seg rows [0:BB)      = mask/len         -> hidden
    # seg rows [BB:2*BB)   = mask*weight/len  -> pooled
    hp = jnp.dot(seg_ref[...], enc.astype(seg_ref.dtype),
                 preferred_element_type=jnp.float32)  # (2*BB, HP)

    # ---- decoder head: hidden @ ud_pad + pooled @ wd_pad + bd ---------------
    wdec = wdec_ref[...]                              # (2*HP, NP_PAD)
    hid = hp[:BB].astype(wdec.dtype)
    pld = hp[BB:].astype(wdec.dtype)
    logits = (jnp.dot(hid, wdec[:HP], preferred_element_type=jnp.float32)
              + jnp.dot(pld, wdec[HP:], preferred_element_type=jnp.float32)
              + bdec_ref[...])                        # (BB, NP_PAD) f32
    logits_ref[...] = logits                          # lane-dense store

    # ---- CrossEntropyLoss (sum over this step's examples), all f32 ----------
    lane = jax.lax.broadcasted_iota(jnp.int32, logits.shape, 1)
    valid = lane < NP                                 # mask padded logit lanes
    lg = jnp.where(valid, logits, -1e30)              # f32 sentinel (keep f32!)
    m = jnp.max(lg, axis=-1, keepdims=True)
    zl = lg - m
    ez = jnp.where(valid, jnp.exp(zl), 0.0)
    logp = zl - jnp.log(jnp.sum(ez, axis=-1, keepdims=True))
    nll = -jnp.sum(logp * oh_ref[...], axis=-1, keepdims=True)   # (BB, 1)

    # Per-step partial sum, broadcast into a lane-dense block; reduced on the
    # host.  Keeps the batch axis "parallel" (2 TensorCores on v7x).
    loss_ref[...] = jnp.broadcast_to(jnp.sum(nll), loss_ref.shape).astype(jnp.float32)


# ----------------------------------------------------------------------------
# Tile-size helper.  The kernel is step-overhead bound, not MXU bound, so we
# target ~2048 rows per step (VMEM is never the constraint at these sizes).
# ----------------------------------------------------------------------------
def _pick_bb(B, T, rows_per_step):
    target = max(1, rows_per_step // T)
    for bb in range(min(target, B), 0, -1):
        if B % bb == 0 and (bb % 8 == 0 or bb == B):
            return bb
    return B


def _pad2(a, rows, cols):
    r, c = a.shape
    return jnp.pad(a, ((0, rows - r), (0, cols - c)))


# ----------------------------------------------------------------------------
# Wrapper: host-side operand fusion + BlockSpecs / grid over batch tiles.
# ----------------------------------------------------------------------------
def cvt_forward_pallas(word, posi, weight_vec, mask, polarity, params,
                       *, compute_dtype=jnp.bfloat16, rows_per_step=2048):
    B, T, E = word.shape
    P = posi.shape[-1]
    H, NP = params["wd"].shape
    HP = max(128, ((H + 127) // 128) * 128)           # hidden padded to vreg width
    NP_PAD = max(128, ((NP + 127) // 128) * 128)      # lane-dense logits width

    BB = _pick_bb(B, T, rows_per_step)
    assert B % BB == 0
    nsteps = B // BB

    # ---- fuse inputs on the host --------------------------------------------
    wp = jnp.concatenate([word, posi], axis=-1).reshape(B * T, E + P)
    wp = wp.astype(compute_dtype)                     # (B*T, E+P)

    mask = mask.astype(jnp.float32)
    len_f = jnp.sum(mask, axis=1, keepdims=True)      # valid-token count
    inv_len = 1.0 / jnp.maximum(len_f, 1.0)           # guard fully-padded rows
    w_hidden = mask * inv_len                                      # (B, T)
    w_pooled = mask * weight_vec.astype(jnp.float32) * inv_len     # (B, T)

    # Block-diagonal pooling (segment) matrix per step: (2*BB, BB*T).
    eye = jnp.eye(BB, dtype=jnp.float32)
    wh = w_hidden.reshape(nsteps, BB, T)
    wpl = w_pooled.reshape(nsteps, BB, T)
    seg_h = jnp.einsum("ij,sjt->sijt", eye, wh).reshape(nsteps, BB, BB * T)
    seg_p = jnp.einsum("ij,sjt->sijt", eye, wpl).reshape(nsteps, BB, BB * T)
    seg = jnp.concatenate([seg_h, seg_p], axis=1)
    seg = seg.reshape(nsteps * 2 * BB, BB * T).astype(compute_dtype)

    # Lane-dense one-hot targets (replaces the (BB,1) polarity block).
    onehot = jax.nn.one_hot(polarity.astype(jnp.int32), NP_PAD, dtype=jnp.float32)

    # ---- fuse / pad weights on the host --------------------------------------
    wenc = jnp.concatenate(
        [jnp.concatenate([_pad2(params["wwf"], E, HP), _pad2(params["wwb"], E, HP)], axis=1),
         jnp.concatenate([_pad2(params["wpf"], P, HP), _pad2(params["wpb"], P, HP)], axis=1)],
        axis=0).astype(compute_dtype)                 # (E+P, 2*HP)
    benc = jnp.concatenate([_pad2(params["bef"], 1, HP),
                            _pad2(params["beb"], 1, HP)], axis=1)        # (1, 2*HP) f32
    wdec = jnp.concatenate([_pad2(params["ud"], HP, NP_PAD),
                            _pad2(params["wd"], HP, NP_PAD)],
                           axis=0).astype(compute_dtype)                 # (2*HP, NP_PAD)
    bdec = _pad2(params["bd"], 1, NP_PAD)                                # (1, NP_PAD) f32

    kernel = functools.partial(_cvt_kernel, HP=HP, NP=NP, BB=BB)
    per_b2 = lambda b: (b, 0)
    per_b3 = lambda b: (b, 0, 0)
    shared = lambda b: (0, 0)

    def shared_spec(shape):
        # Grid-invariant weights: single-buffer when the grid actually loops
        # (saves the redundant second VMEM buffer; irrelevant for grid=(1,)).
        if nsteps > 1 and hasattr(pl, "Buffered"):
            try:
                return pl.BlockSpec(shape, shared, pipeline_mode=pl.Buffered(1))
            except TypeError:
                pass
        return pl.BlockSpec(shape, shared)

    grid_spec = pltpu.PrefetchScalarGridSpec(
        num_scalar_prefetch=0,
        grid=(nsteps,),
        in_specs=[
            pl.BlockSpec((BB * T, E + P), per_b2),    # fused [word | position]
            pl.BlockSpec((2 * BB, BB * T), per_b2),   # pooling segment matrix
            pl.BlockSpec((BB, NP_PAD), per_b2),       # one-hot polarity targets
            shared_spec((E + P, 2 * HP)),             # fused encoder weight
            shared_spec((1, 2 * HP)),                 # fused encoder bias
            shared_spec((2 * HP, NP_PAD)),            # [ud_pad ; wd_pad]
            shared_spec((1, NP_PAD)),                 # decoder bias (padded)
        ],
        out_specs=[
            pl.BlockSpec((BB, NP_PAD), per_b2),       # lane-dense logits slab
            pl.BlockSpec((1, 8, 128), per_b3),        # per-step loss partials
        ],
    )

    logits_pad, loss_parts = pl.pallas_call(
        kernel,
        out_shape=(jax.ShapeDtypeStruct((B, NP_PAD), jnp.float32),
                   jax.ShapeDtypeStruct((nsteps, 8, 128), jnp.float32)),
        grid_spec=grid_spec,
        # No resident accumulator -> the batch axis is truly parallel (v7x 2 TC).
        compiler_params=pltpu.CompilerParams(dimension_semantics=("parallel",)),
    )(wp, seg, onehot, wenc, benc, wdec, bdec)

    loss = jnp.sum(loss_parts[:, 0, 0]) / B
    return loss, logits_pad[:, :NP]


# ----------------------------------------------------------------------------
# Pure-JAX reference of the same math (for a sanity check).
# ----------------------------------------------------------------------------
def cvt_forward_reference(word, posi, weight_vec, mask, polarity, params):
    fwd = jnp.tanh(word @ params["wwf"] + posi @ params["wpf"] + params["bef"])
    bwd = jnp.tanh(word @ params["wwb"] + posi @ params["wpb"] + params["beb"])
    up = (fwd + bwd) * mask[..., None]
    len_f = jnp.maximum(jnp.sum(mask, axis=1, keepdims=True), 1.0)
    hidden = jnp.sum(up, axis=1) / len_f
    uw = up * weight_vec[..., None]
    pooled = jnp.sum(uw, axis=1) / len_f
    logits = pooled @ params["wd"] + hidden @ params["ud"] + params["bd"]
    logp = jax.nn.log_softmax(logits, axis=-1)
    nll = -jnp.take_along_axis(logp, polarity[:, None], axis=1)[:, 0]
    return jnp.mean(nll), logits


if __name__ == "__main__":
    # ---------------- hyper-params (small, consistent with the module) -------
    B = 32                    # batch
    T = 16                    # max_seq_len (tokenizer.max_seq_len)
    E = 32                    # pretrained word-embedding dim
    P = 8                     # opt.position_embedding_size
    H = 32                    # opt.encoder_hidden_size
    NUM_POLAR = 3
    NUM_POSITION = 20
    VOCAB = 50
    A_LEN = 4                 # aspect_indices length
    WINDOW_WEIGHT = 3         # opt.window_weight

    key = jax.random.PRNGKey(0)
    keys = jax.random.split(key, 16)

    # ---------------- parameters (deterministic, synthetic) ------------------
    word_table = jax.random.normal(keys[0], (VOCAB, E), jnp.float32) * 0.1
    pos_table = jax.random.normal(keys[1], (NUM_POSITION + 1, P), jnp.float32) * 0.1
    params = {
        "wwf": jax.random.normal(keys[2], (E, H), jnp.float32) * 0.1,
        "wwb": jax.random.normal(keys[3], (E, H), jnp.float32) * 0.1,
        "wpf": jax.random.normal(keys[4], (P, H), jnp.float32) * 0.1,
        "wpb": jax.random.normal(keys[5], (P, H), jnp.float32) * 0.1,
        "bef": jax.random.normal(keys[6], (1, H), jnp.float32) * 0.1,
        "beb": jax.random.normal(keys[7], (1, H), jnp.float32) * 0.1,
        "wd": jax.random.normal(keys[8], (H, NUM_POLAR), jnp.float32) * 0.1,
        "ud": jax.random.normal(keys[9], (H, NUM_POLAR), jnp.float32) * 0.1,
        "bd": jax.random.normal(keys[10], (1, NUM_POLAR), jnp.float32) * 0.1,
    }

    # ---------------- inputs (inputs_cols order) ------------------------------
    context_indices = jax.random.randint(keys[11], (B, T), 1, VOCAB)
    position_indices = jax.random.randint(keys[12], (B, T), 0, NUM_POSITION + 1)
    aspect_indices = jax.random.randint(keys[13], (B, A_LEN), 1, VOCAB)
    aspect_boundary = jnp.stack([jnp.zeros((B,), jnp.int32),
                                 jnp.full((B,), A_LEN - 1, jnp.int32)], axis=1)
    polarity = jax.random.randint(keys[14], (B,), 0, NUM_POLAR)
    len_s = jax.random.randint(keys[15], (B,), 4, T + 1)

    # ---------------- JAX glue (embedding gathers, masks, weights) -----------
    word = word_table[context_indices]                  # (B, T, E)
    posi = pos_table[position_indices]                  # (B, T, P)

    # squeeze_embedding -> keep static T, zero-mask tokens beyond len_s
    mask = (jnp.arange(T)[None, :] < len_s[:, None]).astype(jnp.float32)

    # pool_aspect (computed but unused downstream, matching the torch forward)
    aspect_len = (aspect_boundary[:, 1] - aspect_boundary[:, 0] + 1).astype(jnp.float32)
    aspect_pool = (jnp.sum(word_table[aspect_indices], axis=1)
                   / aspect_len[:, None])[:, None, :]

    # dynamic_features(kind='weight') position-decay weight vector
    window_size = len_s // 1                            # floor_divide(len_x, 1)
    win_w = jnp.minimum(window_size, WINDOW_WEIGHT)     # per-row min
    weight_vec = 1.0 - position_indices.astype(jnp.float32) / float(T)
    weight_vec = jnp.where(position_indices <= win_w[:, None], 1.0, weight_vec)

    # ---------------- default path: bf16 MXU operands on all generations -----
    loss16, out16 = cvt_forward_pallas(word, posi, weight_vec, mask, polarity, params)
    jax.block_until_ready((loss16, out16, aspect_pool))

    ref_loss, ref_out = cvt_forward_reference(word, posi, weight_vec, mask,
                                              polarity, params)
    np.testing.assert_allclose(np.asarray(out16), np.asarray(ref_out),
                               rtol=5e-2, atol=3e-2)
    np.testing.assert_allclose(np.asarray(loss16), np.asarray(ref_loss),
                               rtol=5e-2, atol=3e-2)

    # ---------------- f32 validation path ------------------------------------
    loss32, out32 = cvt_forward_pallas(word, posi, weight_vec, mask, polarity,
                                       params, compute_dtype=jnp.float32)
    jax.block_until_ready((loss32, out32))
    np.testing.assert_allclose(np.asarray(out32), np.asarray(ref_out),
                               rtol=1e-3, atol=1e-3)
    np.testing.assert_allclose(np.asarray(loss32), np.asarray(ref_loss),
                               rtol=1e-3, atol=1e-3)

    print("KERNEL_OK")
</pallas_src>

<mosaic_0001>
module attributes {stable_mosaic.version = 11 : i64} {
  func.func @_cvt_kernel(%arg0: i32, %arg1: memref<512x40xbf16, #tpu.memory_space<vmem>>, %arg2: memref<64x512xbf16, #tpu.memory_space<vmem>>, %arg3: memref<32x128xf32, #tpu.memory_space<vmem>>, %arg4: memref<40x256xbf16, #tpu.memory_space<vmem>>, %arg5: memref<1x256xf32, #tpu.memory_space<vmem>>, %arg6: memref<256x128xbf16, #tpu.memory_space<vmem>>, %arg7: memref<1x128xf32, #tpu.memory_space<vmem>>, %arg8: memref<32x128xf32, #tpu.memory_space<vmem>>, %arg9: memref<1x8x128xf32, #tpu.memory_space<vmem>>) attributes {dimension_semantics = [#tpu.dimension_semantics<parallel>], iteration_bounds = array<i64: 1>, scalar_prefetch = 0 : i64, scratch_operands = 0 : i64, tpu.core_type = #tpu.core_type<tc>, window_params = [{transform_indices = @transform_0, window_bounds = array<i64: 512, 40>}, {transform_indices = @transform_1, window_bounds = array<i64: 64, 512>}, {transform_indices = @transform_2, window_bounds = array<i64: 32, 128>}, {pipeline_mode = #tpu.pipeline_mode<synchronous>, transform_indices = @transform_3, window_bounds = array<i64: 40, 256>}, {pipeline_mode = #tpu.pipeline_mode<synchronous>, transform_indices = @transform_4, window_bounds = array<i64: 1, 256>}, {pipeline_mode = #tpu.pipeline_mode<synchronous>, transform_indices = @transform_5, window_bounds = array<i64: 256, 128>}, {pipeline_mode = #tpu.pipeline_mode<synchronous>, transform_indices = @transform_6, window_bounds = array<i64: 1, 128>}, {transform_indices = @transform_7, window_bounds = array<i64: 32, 128>}, {transform_indices = @transform_8, window_bounds = array<i64: 1, 8, 128>}]} {
    %c0 = arith.constant 0 : index
    %c0_0 = arith.constant 0 : index
    %0 = vector.load %arg1[%c0, %c0_0] : memref<512x40xbf16, #tpu.memory_space<vmem>>, vector<512x40xbf16>
    %c0_1 = arith.constant 0 : index
    %c0_2 = arith.constant 0 : index
    %1 = vector.load %arg4[%c0_1, %c0_2] : memref<40x256xbf16, #tpu.memory_space<vmem>>, vector<40x256xbf16>
    %cst = arith.constant dense<0.000000e+00> : vector<512x256xf32>
    %2 = tpu.matmul %0, %1, %cst {dimension_numbers = #tpu.dot_dimension_numbers<[1], [0], [0], [1], [0, 0, 1, 1], [], []>} : vector<512x40xbf16>, vector<40x256xbf16>, vector<512x256xf32> -> vector<512x256xf32>
    %c0_3 = arith.constant 0 : index
    %c0_4 = arith.constant 0 : index
    %3 = vector.load %arg5[%c0_3, %c0_4] : memref<1x256xf32, #tpu.memory_space<vmem>>, vector<1x256xf32>
    %4 = vector.broadcast %3 : vector<1x256xf32> to vector<512x256xf32>
    %5 = arith.addf %2, %4 : vector<512x256xf32>
    %6 = math.tanh %5 : vector<512x256xf32>
    %7 = vector.extract_strided_slice %6 {offsets = [0, 0], sizes = [512, 128], strides = [1, 1]} : vector<512x256xf32> to vector<512x128xf32>
    %8 = vector.extract_strided_slice %6 {offsets = [0, 128], sizes = [512, 128], strides = [1, 1]} : vector<512x256xf32> to vector<512x128xf32>
    %9 = arith.addf %7, %8 : vector<512x128xf32>
    %c0_5 = arith.constant 0 : index
    %c0_6 = arith.constant 0 : index
    %10 = vector.load %arg2[%c0_5, %c0_6] : memref<64x512xbf16, #tpu.memory_space<vmem>>, vector<64x512xbf16>
    %11 = arith.truncf %9 : vector<512x128xf32> to vector<512x128xbf16>
    %cst_7 = arith.constant dense<0.000000e+00> : vector<64x128xf32>
    %12 = tpu.matmul %10, %11, %cst_7 {dimension_numbers = #tpu.dot_dimension_numbers<[1], [0], [0], [1], [0, 0, 1, 1], [], []>} : vector<64x512xbf16>, vector<512x128xbf16>, vector<64x128xf32> -> vector<64x128xf32>
    %c0_8 = arith.constant 0 : index
    %c0_9 = arith.constant 0 : index
    %13 = vector.load %arg6[%c0_8, %c0_9] : memref<256x128xbf16, #tpu.memory_space<vmem>>, vector<256x128xbf16>
    %14 = vector.extract_strided_slice %12 {offsets = [0, 0], sizes = [32, 128], strides = [1, 1]} : vector<64x128xf32> to vector<32x128xf32>
    %15 = arith.truncf %14 : vector<32x128xf32> to vector<32x128xbf16>
    %16 = vector.extract_strided_slice %12 {offsets = [32, 0], sizes = [32, 128], strides = [1, 1]} : vector<64x128xf32> to vector<32x128xf32>
    %17 = arith.truncf %16 : vector<32x128xf32> to vector<32x128xbf16>
    %18 = vector.extract_strided_slice %13 {offsets = [0, 0], sizes = [128, 128], strides = [1, 1]} : vector<256x128xbf16> to vector<128x128xbf16>
    %cst_10 = arith.constant dense<0.000000e+00> : vector<32x128xf32>
    %19 = tpu.matmul %15, %18, %cst_10 {dimension_numbers = #tpu.dot_dimension_numbers<[1], [0], [0], [1], [0, 0, 1, 1], [], []>} : vector<32x128xbf16>, vector<128x128xbf16>, vector<32x128xf32> -> vector<32x128xf32>
    %20 = vector.extract_strided_slice %13 {offsets = [128, 0], sizes = [128, 128], strides = [1, 1]} : vector<256x128xbf16> to vector<128x128xbf16>
    %cst_11 = arith.constant dense<0.000000e+00> : vector<32x128xf32>
    %21 = tpu.matmul %17, %20, %cst_11 {dimension_numbers = #tpu.dot_dimension_numbers<[1], [0], [0], [1], [0, 0, 1, 1], [], []>} : vector<32x128xbf16>, vector<128x128xbf16>, vector<32x128xf32> -> vector<32x128xf32>
    %22 = arith.addf %19, %21 : vector<32x128xf32>
    %c0_12 = arith.constant 0 : index
    %c0_13 = arith.constant 0 : index
    %23 = vector.load %arg7[%c0_12, %c0_13] : memref<1x128xf32, #tpu.memory_space<vmem>>, vector<1x128xf32>
    %24 = vector.broadcast %23 : vector<1x128xf32> to vector<32x128xf32>
    %25 = arith.addf %22, %24 : vector<32x128xf32>
    %c0_14 = arith.constant 0 : index
    %c0_15 = arith.constant 0 : index
    %26 = vector.load %arg8[%c0_14, %c0_15] : memref<32x128xf32, #tpu.memory_space<vmem>>, vector<32x128xf32>
    tpu.vector_store %arg8[%c0_14, %c0_15], %25 {strides = array<i32>} : memref<32x128xf32, #tpu.memory_space<vmem>>, vector<32x128xf32>,
    %27 = tpu.iota {dimensions = array<i32: 1>} : vector<32x128xi32>
    %c3_i32 = arith.constant 3 : i32
    %28 = vector.broadcast %c3_i32 : i32 to vector<32x128xi32>
    %29 = arith.cmpi slt, %27, %28 : vector<32x128xi32>
    %cst_16 = arith.constant -1.000000e+30 : f32
    %30 = vector.broadcast %cst_16 : f32 to vector<32x128xf32>
    %31 = arith.select %29, %25, %30 : vector<32x128xi1>, vector<32x128xf32>
    %cst_17 = arith.constant dense<0xFF800000> : vector<32xf32>
    %32 = vector.multi_reduction <maximumf>, %31, %cst_17 [1] : vector<32x128xf32> to vector<32xf32>
    %33 = vector.shape_cast %32 : vector<32xf32> to vector<32x1xf32>
    %34 = vector.broadcast %33 : vector<32x1xf32> to vector<32x128xf32>
    %35 = arith.subf %31, %34 : vector<32x128xf32>
    %36 = math.exp %35 : vector<32x128xf32>
    %cst_18 = arith.constant 0.000000e+00 : f32
    %37 = vector.broadcast %cst_18 : f32 to vector<32x128xf32>
    %38 = arith.select %29, %36, %37 : vector<32x128xi1>, vector<32x128xf32>
    %cst_19 = arith.constant dense<0.000000e+00> : vector<32xf32>
    %39 = vector.multi_reduction <add>, %38, %cst_19 [1] : vector<32x128xf32> to vector<32xf32>
    %40 = vector.shape_cast %39 : vector<32xf32> to vector<32x1xf32>
    %41 = math.log %40 : vector<32x1xf32>
    %42 = vector.broadcast %41 : vector<32x1xf32> to vector<32x128xf32>
    %43 = arith.subf %35, %42 : vector<32x128xf32>
    %c0_20 = arith.constant 0 : index
    %c0_21 = arith.constant 0 : index
    %44 = vector.load %arg3[%c0_20, %c0_21] : memref<32x128xf32, #tpu.memory_space<vmem>>, vector<32x128xf32>
    %45 = arith.mulf %43, %44 : vector<32x128xf32>
    %cst_22 = arith.constant dense<0.000000e+00> : vector<32xf32>
    %46 = vector.multi_reduction <add>, %45, %cst_22 [1] : vector<32x128xf32> to vector<32xf32>
    %47 = vector.shape_cast %46 : vector<32xf32> to vector<32x1xf32>
    %cst_23 = arith.constant 0.000000e+00 : f32
    %48 = vector.broadcast %cst_23 : f32 to vector<32x1xf32>
    %49 = arith.subf %48, %47 : vector<32x1xf32>
    %50 = vector.shape_cast %49 : vector<32x1xf32> to vector<1x32x1xf32>
    %cst_24 = arith.constant dense<0.000000e+00> : vector<1xf32>
    %51 = vector.multi_reduction <add>, %50, %cst_24 [1, 2] : vector<1x32x1xf32> to vector<1xf32>
    %52 = vector.shape_cast %51 : vector<1xf32> to vector<1x1x1xf32>
    %53 = vector.extract %52[0, 0, 0] : f32 from vector<1x1x1xf32>
    %54 = vector.broadcast %53 : f32 to vector<1x8x128xf32>
    %c0_25 = arith.constant 0 : index
    %c0_26 = arith.constant 0 : index
    %c0_27 = arith.constant 0 : index
    %55 = vector.load %arg9[%c0_25, %c0_26, %c0_27] : memref<1x8x128xf32, #tpu.memory_space<vmem>>, vector<1x8x128xf32>
    tpu.vector_store %arg9[%c0_25, %c0_26, %c0_27], %54 {strides = array<i32>} : memref<1x8x128xf32, #tpu.memory_space<vmem>>, vector<1x8x128xf32>,
    return
  }
  func.func @transform_0(%arg0: i32) -> (i32, i32) {
    %c0_i32 = arith.constant 0 : i32
    %c0_i32_0 = arith.constant 0 : i32
    return %arg0, %c0_i32 : i32, i32
  }
  func.func @transform_1(%arg0: i32) -> (i32, i32) {
    %c0_i32 = arith.constant 0 : i32
    %c0_i32_0 = arith.constant 0 : i32
    return %arg0, %c0_i32 : i32, i32
  }
  func.func @transform_2(%arg0: i32) -> (i32, i32) {
    %c0_i32 = arith.constant 0 : i32
    %c0_i32_0 = arith.constant 0 : i32
    return %arg0, %c0_i32 : i32, i32
  }
  func.func @transform_3(%arg0: i32) -> (i32, i32) {
    %c0_i32 = arith.constant 0 : i32
    %c0_i32_0 = arith.constant 0 : i32
    %c0_i32_1 = arith.constant 0 : i32
    return %c0_i32, %c0_i32_0 : i32, i32
  }
  func.func @transform_4(%arg0: i32) -> (i32, i32) {
    %c0_i32 = arith.constant 0 : i32
    %c0_i32_0 = arith.constant 0 : i32
    %c0_i32_1 = arith.constant 0 : i32
    return %c0_i32, %c0_i32_0 : i32, i32
  }
  func.func @transform_5(%arg0: i32) -> (i32, i32) {
    %c0_i32 = arith.constant 0 : i32
    %c0_i32_0 = arith.constant 0 : i32
    %c0_i32_1 = arith.constant 0 : i32
    return %c0_i32, %c0_i32_0 : i32, i32
  }
  func.func @transform_6(%arg0: i32) -> (i32, i32) {
    %c0_i32 = arith.constant 0 : i32
    %c0_i32_0 = arith.constant 0 : i32
    %c0_i32_1 = arith.constant 0 : i32
    return %c0_i32, %c0_i32_0 : i32, i32
  }
  func.func @transform_7(%arg0: i32) -> (i32, i32) {
    %c0_i32 = arith.constant 0 : i32
    %c0_i32_0 = arith.constant 0 : i32
    return %arg0, %c0_i32 : i32, i32
  }
  func.func @transform_8(%arg0: i32) -> (i32, i32, i32) {
    %c0_i32 = arith.constant 0 : i32
    %c0_i32_0 = arith.constant 0 : i32
    %c0_i32_1 = arith.constant 0 : i32
    return %arg0, %c0_i32, %c0_i32_0 : i32, i32, i32
  }
}

</mosaic_0001>

<bundles_post_ra>
// kernel: tpu_custom_call.1
= control target key start
LH: loop header
LB: loop body
LE: loop exit
PB: predicated region body
PF: predicated region fallthrough
CT: control target
= control target key end

     0   :  { %14 = vsyncpa [#allocation3], 0  ;;  %vm388_vm0 = vcmask 1043456   ;;  %s3013_s0 = inlined_call_operand.vmem [shape: bf16[512,40], index: 0, kind: input, shape index: {}]   ;;  %s3014_s1 = inlined_call_operand.vmem [shape: bf16[64,512], index: 1, kind: input, shape index: {}]   ;;  %s3015_s2 = inlined_call_operand.vmem [shape: f32[32,128], index: 2, kind: input, shape index: {}]   ;;  %s3016_s3 = inlined_call_operand.vmem [shape: bf16[40,256], index: 3, kind: input, shape index: {}]   ;;  %s3017_s4 = inlined_call_operand.vmem [shape: f32[1,256], index: 4, kind: input, shape index: {}]   ;;  %s3018_s5 = inlined_call_operand.vmem [shape: bf16[256,128], index: 5, kind: input, shape index: {}]   ;;  %s3019_s6 = inlined_call_operand.vmem [shape: f32[1,128], index: 6, kind: input, shape index: {}]   ;;  %s3020_s7 = inlined_call_operand.hbm [shape: f32[32,128], index: 7, kind: output, shape index: {0}]   ;;  %s3021_s8 = inlined_call_operand.hbm [shape: f32[1,8,128], index: 8, kind: output, shape index: {1}]  }
   0x1   :  { %v99_v0 = vld [vmem:[%s3016_s3 + $0x20] sm:$0xff]  ;;  %v1613_v3 = vld [vmem:[%s3016_s3 + $0x10] sm:$0xf]  ;;  %v1846_v6 = vld [vmem:[%s3016_s3 + $0x14] sm:$0xf0] }
   0x2   :  { %v279_v1 = vunpack.c.l.b16 %v99_v0  ;;  %v280_v2 = vunpack.c.h.b16 %v99_v0  ;;  %v1845_v7 = vld [vmem:[%s3016_s3 + $0x14] sm:$0xf]  ;;  %v1615_v8 = vld [vmem:[%s3016_s3 + $0x18] sm:$0xf0] }
   0x4   :  { %v285_v4 = vpack.c.b16 %v279_v1, %v279_v1  ;;  %v286_v5 = vpack.c.b16 %v280_v2, %v280_v2 }
   0x5   :  { %15 = vsyncpa [#allocation5], 0  ;;  %v1614_v11 = vor.u32 %v1846_v6, %v1613_v3  ;;  %v1618_v12 = vor.u32 %v1845_v7, %v1615_v8  ;;  %v1605_v13 = vld [vmem:[%s3016_s3] sm:$0xf]  ;;  %v1844_v14 = vld [vmem:[%s3016_s3 + $0x4] sm:$0xf0] }
   0x6   :  { %v390_v9 = vsel %vm388_vm0, %v285_v4, 0  ;;  %v393_v10 = vsel %vm388_vm0, %v286_v5, 0  ;;  %v1843_v15 = vld [vmem:[%s3016_s3 + $0x4] sm:$0xf]  ;;  %v1607_v16 = vld [vmem:[%s3016_s3 + $0x8] sm:$0xf0]  ;;  %v1606_v17 = vor.u32 %v1844_v14, %v1605_v13 }
   0x7   :  { %400 = vmatpush.bf16.msra.mxu0 %v390_v9  ;;  %569 = vmatpush.bf16.msra.mxu1 %v393_v10  ;;  %v1610_v18 = vor.u32 %v1843_v15, %v1607_v16  ;;  %v1811_v19 = vld [vmem:[%s3013_s0] sm:$0xff]  ;;  %vm291_vm1 = vcmask 326656   ;;  %v1812_v20 = vld [vmem:[%s3013_s0 + $0x8] sm:$0xff]  ;;  %v1813_v21 = vld [vmem:[%s3013_s0 + $0x10] sm:$0xff]  ;;  %vm1422_vm3 = vcmask 7168   ;;  %s1447_s22 = sshll.u32 %s3020_s7, 4  ;;  %s1448_s22 = int_to_ptr.hbm [resolvable:$true] %s1447_s22 }
   0x8   :  { %1882 = vmatpush.bf16.msra.mxu3 %v393_v10  ;;  %1879 = vmatpush.bf16.msra.mxu2 %v390_v9  ;;  %v1814_v22 = vld [vmem:[%s3013_s0 + $0x18] sm:$0xff]  ;;  %v1815_v23 = vld [vmem:[%s3013_s0 + $0x20] sm:$0xff]  ;;  %v2320_v24 = vld [vmem:[%s3013_s0 + $0xa8] sm:$0xff]  ;;  %s2217_s23 = smov 128   ;;  %s2218_s24 = smov 8  }
   0x9   :  { %v1816_v25 = vld [vmem:[%s3013_s0 + $0x28] sm:$0xff]  ;;  %v1833_v26 = vld [vmem:[%s3013_s0 + $0xb0] sm:$0xff]  ;;  %v1834_v28 = vld [vmem:[%s3013_s0 + $0xb8] sm:$0xff]  ;;  %s2219_s3 = smov [#allocation4]   ;;  %s1461_s27 = sshll.u32 %s3021_s8, 4  ;;  %s1462_s27 = int_to_ptr.hbm [resolvable:$true] %s1461_s27 }
   0xa   :  { %v1817_v27 = vld [vmem:[%s3013_s0 + $0x30] sm:$0xff]  ;;  %v1818_v29 = vld [vmem:[%s3013_s0 + $0x38] sm:$0xff]  ;;  %v1835_v30 = vld [vmem:[%s3013_s0 + $0xc0] sm:$0xff]  ;;  %s1459_s25 = sshll.u32 %s2219_s3, 4  ;;  %s1460_s25 = int_to_ptr.vmem [resolvable:$true] %s1459_s25 }
   0xb   :  { %401 = vmatpush.bf16.msra.mxu0 %v1614_v11  ;;  %570 = vmatpush.bf16.msra.mxu1 %v1618_v12  ;;  %v100_v31 = vld [vmem:[%s3017_s4] sm:$0x3]  ;;  %v1836_v44 = vld [vmem:[%s3013_s0 + $0xc8] sm:$0xff]  ;;  %v1837_v61 = vld [vmem:[%s3013_s0 + $0xd0] sm:$0xff] }
   0xc   :  { %1883 = vmatpush.bf16.msra.mxu3 %v1618_v12  ;;  %1880 = vmatpush.bf16.msra.mxu2 %v1614_v11  ;;  %v2357_v32 = vperm.slane %v100_v31, 0  ;;  %v2359_v33 = vperm.slane %v100_v31, 1  ;;  %v1819_v34 = vld [vmem:[%s3013_s0 + $0x40] sm:$0xff]  ;;  %v1820_v47 = vld [vmem:[%s3013_s0 + $0x48] sm:$0xff]  ;;  %v1821_v0 = vld [vmem:[%s3013_s0 + $0x50] sm:$0xff] }
   0xd   :  { %v1838_v14 = vld [vmem:[%s3013_s0 + $0xd8] sm:$0xff] }
   0xf   :  { %402 = vmatpush.bf16.msra.mxu0 %v1606_v17  ;;  %571 = vmatpush.bf16.msra.mxu1 %v1610_v18 }
  0x10   :  { %1884 = vmatpush.bf16.msra.mxu3 %v1610_v18  ;;  %1881 = vmatpush.bf16.msra.mxu2 %v1606_v17  ;;  %v1822_v17 = vld [vmem:[%s3013_s0 + $0x58] sm:$0xff] }
  0x12   :  { %1619 = vmatmul.msk.bf16.vlgmr.msra.gmra.mxu0 %vm291_vm1, %v1811_v19  ;;  %1651 = vmatmul.msk.bf16.vlgmr.msra.gmra.mxu1 %vm291_vm1, %v1811_v19 }
  0x13   :  { %1672 = vmatmul.msk.bf16.vlgmr.msra.gmra.mxu3 %vm291_vm1, %v2320_v24  ;;  %1641 = vmatmul.msk.bf16.vlgmr.msra.gmra.mxu2 %vm291_vm1, %v1833_v26 }
  0x22   :  { %1620 = vmatmul.msk.bf16.gmra.mxu0 %vm291_vm1, %v1812_v20  ;;  %1652 = vmatmul.msk.bf16.gmra.mxu1 %vm291_vm1, %v1812_v20 }
  0x23   :  { %1673 = vmatmul.msk.bf16.gmra.mxu3 %vm291_vm1, %v1833_v26  ;;  %1642 = vmatmul.msk.bf16.gmra.mxu2 %vm291_vm1, %v1834_v28 }
  0x32   :  { %1621 = vmatmul.msk.bf16.gmra.mxu0 %vm291_vm1, %v1813_v21  ;;  %1653 = vmatmul.msk.bf16.gmra.mxu1 %vm291_vm1, %v1813_v21 }
  0x33   :  { %1674 = vmatmul.msk.bf16.gmra.mxu3 %vm291_vm1, %v1834_v28  ;;  %1643 = vmatmul.msk.bf16.gmra.mxu2 %vm291_vm1, %v1835_v30 }
  0x42   :  { %1622 = vmatmul.msk.bf16.gmra.mxu0 %vm291_vm1, %v1814_v22  ;;  %1654 = vmatmul.msk.bf16.gmra.mxu1 %vm291_vm1, %v1814_v22 }
  0x43   :  { %1675 = vmatmul.msk.bf16.gmra.mxu3 %vm291_vm1, %v1835_v30  ;;  %1644 = vmatmul.msk.bf16.gmra.mxu2 %vm291_vm1, %v1836_v44 }
  0x52   :  { %1623 = vmatmul.msk.bf16.gmra.mxu0 %vm291_vm1, %v1815_v23  ;;  %1655 = vmatmul.msk.bf16.gmra.mxu1 %vm291_vm1, %v1815_v23 }
  0x53   :  { %1676 = vmatmul.msk.bf16.gmra.mxu3 %vm291_vm1, %v1836_v44  ;;  %1645 = vmatmul.msk.bf16.gmra.mxu2 %vm291_vm1, %v1837_v61 }
  0x62   :  { %1624 = vmatmul.msk.bf16.gmra.mxu0 %vm291_vm1, %v1816_v25  ;;  %1656 = vmatmul.msk.bf16.gmra.mxu1 %vm291_vm1, %v1816_v25 }
  0x63   :  { %1677 = vmatmul.msk.bf16.gmra.mxu3 %vm291_vm1, %v1837_v61  ;;  %1646 = vmatmul.msk.bf16.gmra.mxu2 %vm291_vm1, %v1838_v14 }
  0x72   :  { %1625 = vmatmul.msk.bf16.gmra.mxu0 %vm291_vm1, %v1817_v27  ;;  %1657 = vmatmul.msk.bf16.gmra.mxu1 %vm291_vm1, %v1817_v27 }
  0x73   :  { %1678 = vmatmul.msk.bf16.gmra.mxu3 %vm291_vm1, %v1838_v14  ;;  %v1826_v14 = vld [vmem:[%s3013_s0 + $0x78] sm:$0xff] }
  0x82   :  { %1626 = vmatmul.msk.bf16.gmra.mxu0 %vm291_vm1, %v1818_v29  ;;  %1658 = vmatmul.msk.bf16.gmra.mxu1 %vm291_vm1, %v1818_v29 }
  0x8f   :  { %v404_v35 = vpop.f32.mrf.mxu0  ;;  %v573_v36 = vpop.f32.mrf.mxu1 }
  0x90   :  { %v405_v37 = vadd.f32 %v404_v35, %v2357_v32  ;;  %v574_v38 = vadd.f32 %v573_v36, %v2359_v33 }
  0x92   :  { %1892 = vtanh.f32 %v405_v37  ;;  %1627 = vmatmul.msk.bf16.gmra.mxu0 %vm291_vm1, %v1819_v34  ;;  %1659 = vmatmul.msk.bf16.gmra.mxu1 %vm291_vm1, %v1819_v34  ;;  %v1839_v34 = vld [vmem:[%s3013_s0 + $0xe0] sm:$0xff] }
  0x93   :  { %1894 = vtanh.f32 %v574_v38  ;;  %1647 = vmatmul.msk.bf16.gmra.mxu2 %vm291_vm1, %v1839_v34  ;;  %1679 = vmatmul.msk.bf16.gmra.mxu3 %vm291_vm1, %v1839_v34  ;;  %v1823_v37 = vld [vmem:[%s3013_s0 + $0x60] sm:$0xff] }
  0x97   :  { %v406_v39 = vpop.f32.mrf.mxu0  ;;  %v575_v40 = vpop.f32.mrf.mxu1 }
  0x98   :  { %v1893_v41 = vpop.eup %1892  ;;  %v407_v42 = vadd.f32 %v406_v39, %v2357_v32  ;;  %v576_v43 = vadd.f32 %v575_v40, %v2359_v33 }
  0x99   :  { %v1895_v45 = vpop.eup %1894 }
  0x9a   :  { %1896 = vtanh.f32 %v407_v42  ;;  %v2375_v46 = vadd.f32 %v1895_v45, %v1893_v41 }
  0x9b   :  { %1898 = vtanh.f32 %v576_v43 }
  0x9f   :  { %v409_v48 = vpop.f32.mrf.mxu0  ;;  %v578_v49 = vpop.f32.mrf.mxu1 }
  0xa0   :  { %v1897_v50 = vpop.eup %1896  ;;  %v410_v51 = vadd.f32 %v409_v48, %v2357_v32  ;;  %v579_v52 = vadd.f32 %v578_v49, %v2359_v33 }
  0xa1   :  { %v1899_v53 = vpop.eup %1898 }
  0xa2   :  { %1900 = vtanh.f32 %v410_v51  ;;  %1628 = vmatmul.msk.bf16.gmra.mxu0 %vm291_vm1, %v1820_v47  ;;  %1660 = vmatmul.msk.bf16.gmra.mxu1 %vm291_vm1, %v1820_v47  ;;  %v2384_v54 = vadd.f32 %v1899_v53, %v1897_v50  ;;  %v1840_v50 = vld [vmem:[%s3013_s0 + $0xe8] sm:$0xff]  ;;  %v2455_v53 = vpop.f32.mrf.mxu3 }
  0xa3   :  { %1902 = vtanh.f32 %v579_v52  ;;  %1648 = vmatmul.msk.bf16.gmra.mxu2 %vm291_vm1, %v1840_v50  ;;  %1680 = vmatmul.msk.bf16.gmra.mxu3 %vm291_vm1, %v1840_v50 }
  0xa4   :  { %v941_v55 = vpack.c.bf16 %v2384_v54, %v2375_v46 }
  0xa7   :  { %v411_v56 = vpop.f32.mrf.mxu0  ;;  %v580_v57 = vpop.f32.mrf.mxu1 }
  0xa8   :  { %v1901_v58 = vpop.eup %1900  ;;  %v412_v59 = vadd.f32 %v411_v56, %v2357_v32  ;;  %v581_v60 = vadd.f32 %v580_v57, %v2359_v33  ;;  %v1824_v56 = vld [vmem:[%s3013_s0 + $0x68] sm:$0xff] }
  0xa9   :  { %v1903_v62 = vpop.eup %1902 }
  0xaa   :  { %1904 = vtanh.f32 %v412_v59  ;;  %v2395_v63 = vadd.f32 %v1903_v62, %v1901_v58  ;;  %v2462_v59 = vpop.f32.mrf.mxu3  ;;  %v1841_v62 = vld [vmem:[%s3013_s0 + $0xf0] sm:$0xff] }
  0xab   :  { %1906 = vtanh.f32 %v581_v60 }
  0xaf   :  { %v414_v1 = vpop.f32.mrf.mxu0  ;;  %v583_v2 = vpop.f32.mrf.mxu1 }
  0xb0   :  { %v1905_v3 = vpop.eup %1904  ;;  %v415_v4 = vadd.f32 %v414_v1, %v2357_v32  ;;  %v584_v5 = vadd.f32 %v583_v2, %v2359_v33  ;;  %v1825_v2 = vld [vmem:[%s3013_s0 + $0x70] sm:$0xff] }
  0xb1   :  { %v1907_v6 = vpop.eup %1906 }
  0xb2   :  { %1908 = vtanh.f32 %v415_v4  ;;  %1629 = vmatmul.msk.bf16.gmra.mxu0 %vm291_vm1, %v1821_v0  ;;  %1661 = vmatmul.msk.bf16.gmra.mxu1 %vm291_vm1, %v1821_v0  ;;  %v2404_v7 = vadd.f32 %v1907_v6, %v1905_v3  ;;  %v2469_v0 = vpop.f32.mrf.mxu2  ;;  %v2471_v1 = vpop.f32.mrf.mxu3 }
  0xb3   :  { %1910 = vtanh.f32 %v584_v5  ;;  %1649 = vmatmul.msk.bf16.gmra.mxu2 %vm291_vm1, %v1841_v62  ;;  %1681 = vmatmul.msk.bf16.gmra.mxu3 %vm291_vm1, %v1841_v62 }
  0xb4   :  { %v942_v8 = vpack.c.bf16 %v2404_v7, %v2395_v63 }
  0xb7   :  { %v416_v9 = vpop.f32.mrf.mxu0  ;;  %v585_v10 = vpop.f32.mrf.mxu1 }
  0xb8   :  { %v1909_v11 = vpop.eup %1908  ;;  %v417_v12 = vadd.f32 %v416_v9, %v2357_v32  ;;  %v586_v13 = vadd.f32 %v585_v10, %v2359_v33 }
  0xb9   :  { %v1911_v15 = vpop.eup %1910 }
  0xba   :  { %1912 = vtanh.f32 %v417_v12  ;;  %v2415_v16 = vadd.f32 %v1911_v15, %v1909_v11  ;;  %v2478_v5 = vpop.f32.mrf.mxu2  ;;  %v2480_v6 = vpop.f32.mrf.mxu3  ;;  %v1842_v11 = vld [vmem:[%s3013_s0 + $0xf8] sm:$0xff] }
  0xbb   :  { %1914 = vtanh.f32 %v586_v13 }
  0xbf   :  { %v419_v18 = vpop.f32.mrf.mxu0  ;;  %v588_v19 = vpop.f32.mrf.mxu1 }
  0xc0   :  { %v1913_v20 = vpop.eup %1912  ;;  %v420_v21 = vadd.f32 %v419_v18, %v2357_v32  ;;  %v589_v22 = vadd.f32 %v588_v19, %v2359_v33 }
  0xc1   :  { %v1915_v23 = vpop.eup %1914 }
  0xc2   :  { %1916 = vtanh.f32 %v420_v21  ;;  %1630 = vmatmul.msk.bf16.gmra.mxu0 %vm291_vm1, %v1822_v17  ;;  %1662 = vmatmul.msk.bf16.gmra.mxu1 %vm291_vm1, %v1822_v17  ;;  %v2424_v25 = vadd.f32 %v1915_v23, %v1913_v20  ;;  %v2487_v12 = vpop.f32.mrf.mxu2  ;;  %v2489_v13 = vpop.f32.mrf.mxu3 }
  0xc3   :  { %1918 = vtanh.f32 %v589_v22  ;;  %1650 = vmatmul.msk.bf16.gmra.mxu2 %vm291_vm1, %v1842_v11  ;;  %1682 = vmatmul.msk.bf16.gmra.mxu3 %vm291_vm1, %v1842_v11 }
  0xc4   :  { %v943_v26 = vpack.c.bf16 %v2424_v25, %v2415_v16  ;;  %v1829_v16 = vld [vmem:[%s3013_s0 + $0x90] sm:$0xff] }
  0xc7   :  { %v421_v27 = vpop.f32.mrf.mxu0  ;;  %v590_v28 = vpop.f32.mrf.mxu1 }
  0xc8   :  { %v1917_v29 = vpop.eup %1916  ;;  %v422_v30 = vadd.f32 %v421_v27, %v2357_v32  ;;  %v591_v31 = vadd.f32 %v590_v28, %v2359_v33 }
  0xc9   :  { %v1919_v35 = vpop.eup %1918 }
  0xca   :  { %1920 = vtanh.f32 %v422_v30  ;;  %v2435_v36 = vadd.f32 %v1919_v35, %v1917_v29  ;;  %v2502_v27 = vpop.f32.mrf.mxu2  ;;  %v2504_v28 = vpop.f32.mrf.mxu3 }
  0xcb   :  { %1922 = vtanh.f32 %v591_v31 }
  0xcf   :  { %v424_v38 = vpop.f32.mrf.mxu0  ;;  %v593_v39 = vpop.f32.mrf.mxu1 }
  0xd0   :  { %v1921_v40 = vpop.eup %1920  ;;  %v425_v41 = vadd.f32 %v424_v38, %v2357_v32  ;;  %v594_v42 = vadd.f32 %v593_v39, %v2359_v33 }
  0xd1   :  { %v1923_v43 = vpop.eup %1922 }
  0xd2   :  { %1924 = vtanh.f32 %v425_v41  ;;  %1631 = vmatmul.msk.bf16.gmra.mxu0 %vm291_vm1, %v1823_v37  ;;  %1663 = vmatmul.msk.bf16.gmra.mxu1 %vm291_vm1, %v1823_v37  ;;  %v2444_v44 = vadd.f32 %v1923_v43, %v1921_v40  ;;  %v2516_v50 = vpop.f32.mrf.mxu3 }
  0xd3   :  { %1926 = vtanh.f32 %v594_v42 }
  0xd4   :  { %v944_v45 = vpack.c.bf16 %v2444_v44, %v2435_v36 }
  0xd7   :  { %v426_v47 = vpop.f32.mrf.mxu0  ;;  %v595_v48 = vpop.f32.mrf.mxu1 }
  0xd8   :  { %v1925_v49 = vpop.eup %1924  ;;  %v427_v18 = vadd.f32 %v426_v47, %v2357_v32  ;;  %v596_v19 = vadd.f32 %v595_v48, %v2359_v33 }
  0xd9   :  { %v1927_v51 = vpop.eup %1926 }
  0xda   :  { %v2453_v52 = vadd.f32 %v1927_v51, %v1925_v49  ;;  %1928 = vtanh.f32 %v427_v18  ;;  %v2514_v49 = vpop.f32.mrf.mxu2 }
  0xdb   :  { %1930 = vtanh.f32 %v596_v19 }
  0xdf   :  { %v429_v57 = vpop.f32.mrf.mxu0  ;;  %v598_v58 = vpop.f32.mrf.mxu1 }
  0xe0   :  { %v1929_v38 = vpop.eup %1928  ;;  %v430_v43 = vadd.f32 %v429_v57, %v2357_v32  ;;  %v599_v48 = vadd.f32 %v598_v58, %v2359_v33 }
  0xe1   :  { %v1931_v40 = vpop.eup %1930 }
  0xe2   :  { %1632 = vmatmul.msk.bf16.gmra.mxu0 %vm291_vm1, %v1824_v56  ;;  %1664 = vmatmul.msk.bf16.gmra.mxu1 %vm291_vm1, %v1824_v56  ;;  %v1827_v56 = vld [vmem:[%s3013_s0 + $0x80] sm:$0xff]  ;;  %v2525_v19 = vpop.f32.mrf.mxu2 }
  0xe7   :  { %v431_v60 = vpop.f32.mrf.mxu0  ;;  %v600_v61 = vpop.f32.mrf.mxu1 }
  0xe8   :  { %v432_v39 = vadd.f32 %v431_v60, %v2357_v32  ;;  %v601_v41 = vadd.f32 %v600_v61, %v2359_v33 }
  0xef   :  { %v434_v3 = vpop.f32.mrf.mxu0  ;;  %v603_v4 = vpop.f32.mrf.mxu1 }
  0xf0   :  { %v435_v31 = vadd.f32 %v434_v3, %v2357_v32  ;;  %v604_v37 = vadd.f32 %v603_v4, %v2359_v33 }
  0xf2   :  { %1633 = vmatmul.msk.bf16.gmra.mxu0 %vm291_vm1, %v1825_v2  ;;  %1665 = vmatmul.msk.bf16.gmra.mxu1 %vm291_vm1, %v1825_v2 }
  0xf7   :  { %v436_v9 = vpop.f32.mrf.mxu0  ;;  %v605_v10 = vpop.f32.mrf.mxu1 }
  0xf8   :  { %v437_v20 = vadd.f32 %v436_v9, %v2357_v32  ;;  %v606_v21 = vadd.f32 %v605_v10, %v2359_v33 }
  0xfa   :  { %1932 = vtanh.f32 %v437_v20  ;;  %v2527_v20 = vpop.f32.mrf.mxu3 }
  0xfb   :  { %1934 = vtanh.f32 %v606_v21 }
  0xff   :  { %v439_v15 = vpop.f32.mrf.mxu0  ;;  %v608_v17 = vpop.f32.mrf.mxu1 }
 0x100   :  { %v440_v22 = vadd.f32 %v439_v15, %v2357_v32  ;;  %v609_v23 = vadd.f32 %v608_v17, %v2359_v33  ;;  %v1933_v42 = vpop.eup %1932 }
 0x101   :  { %v1935_v47 = vpop.eup %1934 }
 0x102   :  { %1634 = vmatmul.msk.bf16.gmra.mxu0 %vm291_vm1, %v1826_v14  ;;  %1666 = vmatmul.msk.bf16.gmra.mxu1 %vm291_vm1, %v1826_v14  ;;  %1936 = vtanh.f32 %v440_v22  ;;  %v874_v17 = vadd.f32 %v1935_v47, %v1933_v42  ;;  %v870_v47 = vadd.f32 %v1931_v40, %v1929_v38 }
 0x103   :  { %1938 = vtanh.f32 %v609_v23 }
 0x104   :  { %v945_v38 = vpack.c.bf16 %v870_v47, %v2453_v52 }
 0x107   :  { %v441_v29 = vpop.f32.mrf.mxu0  ;;  %v610_v30 = vpop.f32.mrf.mxu1 }
 0x108   :  { %v442_v34 = vadd.f32 %v441_v29, %v2357_v32  ;;  %v611_v35 = vadd.f32 %v610_v30, %v2359_v33  ;;  %v1937_v51 = vpop.eup %1936 }
 0x109   :  { %v1939_v60 = vpop.eup %1938 }
 0x10a   :  { %1940 = vtanh.f32 %v442_v34  ;;  %v875_v9 = vadd.f32 %v1939_v60, %v1937_v51  ;;  %v2537_v60 = vpop.f32.mrf.mxu2 }
 0x10b   :  { %1942 = vtanh.f32 %v611_v35 }
 0x10c   :  { %1944 = vtanh.f32 %v435_v31 }
 0x10d   :  { %1946 = vtanh.f32 %v604_v37 }
 0x10e   :  { %1948 = vtanh.f32 %v432_v39 }
 0x10f   :  { %1950 = vtanh.f32 %v601_v41  ;;  %v444_v61 = vpop.f32.mrf.mxu0  ;;  %v613_v62 = vpop.f32.mrf.mxu1 }
 0x110   :  { %v1941_v57 = vpop.eup %1940  ;;  %1952 = vtanh.f32 %v430_v43  ;;  %v445_v2 = vadd.f32 %v444_v61, %v2357_v32  ;;  %v614_v58 = vadd.f32 %v613_v62, %v2359_v33  ;;  %v2539_v61 = vpop.f32.mrf.mxu3  ;;  %v1828_v62 = vld [vmem:[%s3013_s0 + $0x88] sm:$0xff] }
 0x111   :  { %v1943_v3 = vpop.eup %1942  ;;  %1954 = vtanh.f32 %v599_v48  ;;  %v520_v48 = vadd.f32 %v2487_v12, %v2357_v32 }
 0x112   :  { %v1945_v4 = vpop.eup %1944  ;;  %1956 = vtanh.f32 %v445_v2  ;;  %1635 = vmatmul.msk.bf16.gmra.mxu0 %vm291_vm1, %v1827_v56  ;;  %v876_v10 = vadd.f32 %v1943_v3, %v1941_v57  ;;  %1667 = vmatmul.msk.bf16.gmra.mxu1 %vm291_vm1, %v1827_v56  ;;  %v689_v56 = vadd.f32 %v2489_v13, %v2359_v33  ;;  %v522_v13 = vadd.f32 %v2502_v27, %v2357_v32 }
 0x113   :  { %v1947_v11 = vpop.eup %1946  ;;  %1958 = vtanh.f32 %v614_v58  ;;  %v517_v27 = vadd.f32 %v2478_v5, %v2357_v32 }
 0x114   :  { %v1949_v14 = vpop.eup %1948  ;;  %v948_v15 = vpack.c.bf16 %v876_v10, %v875_v9  ;;  %v873_v22 = vadd.f32 %v1947_v11, %v1945_v4  ;;  %v691_v4 = vadd.f32 %v2504_v28, %v2359_v33  ;;  %v515_v9 = vadd.f32 %v2469_v0, %v2357_v32  ;;  %v2565_v11 = vpop.f32.mrf.mxu2 }
 0x115   :  { %v1951_v18 = vpop.eup %1950  ;;  %v684_v10 = vadd.f32 %v2471_v1, %v2359_v33  ;;  %v686_v0 = vadd.f32 %v2480_v6, %v2359_v33 }
 0x116   :  { %v1953_v21 = vpop.eup %1952  ;;  %1053 = vmatpush.bf16.msrb.mxu2 %v948_v15  ;;  %v947_v37 = vpack.c.bf16 %v874_v17, %v873_v22  ;;  %v872_v39 = vadd.f32 %v1951_v18, %v1949_v14 }
 0x117   :  { %v1955_v23 = vpop.eup %1954  ;;  %v446_v29 = vpop.f32.mrf.mxu0 }
 0x118   :  { %v615_v30 = vpop.f32.mrf.mxu1  ;;  %v1957_v31 = vpop.eup %1956  ;;  %v447_v34 = vadd.f32 %v446_v29, %v2357_v32  ;;  %v871_v42 = vadd.f32 %v1955_v23, %v1953_v21 }
 0x119   :  { %v616_v35 = vadd.f32 %v615_v30, %v2359_v33  ;;  %v1959_v41 = vpop.eup %1958  ;;  %v2567_v14 = vpop.f32.mrf.mxu3 }
 0x11a   :  { %1960 = vtanh.f32 %v447_v34  ;;  %1054 = vmatpush.bf16.msrb.mxu2 %v947_v37  ;;  %v2531_v43 = vadd.f32 %v1959_v41, %v1957_v31  ;;  %v946_v51 = vpack.c.bf16 %v872_v39, %v871_v42 }
 0x11b   :  { %1962 = vtanh.f32 %v616_v35 }
 0x11c   :  { %1964 = vtanh.f32 %v520_v48  ;;  %v2579_v30 = vpop.f32.mrf.mxu2 }
 0x11d   :  { %1966 = vtanh.f32 %v689_v56 }
 0x11e   :  { %1055 = vmatpush.bf16.msrb.mxu2 %v946_v51 }
 0x11f   :  { %v449_v57 = vpop.f32.mrf.mxu0 }
 0x120   :  { %v618_v2 = vpop.f32.mrf.mxu1  ;;  %v1961_v40 = vpop.eup %1960  ;;  %v450_v12 = vadd.f32 %v449_v57, %v2357_v32 }
 0x121   :  { %v619_v58 = vadd.f32 %v618_v2, %v2359_v33  ;;  %v1963_v3 = vpop.eup %1962  ;;  %v2581_v31 = vpop.f32.mrf.mxu3 }
 0x122   :  { %1968 = vtanh.f32 %v450_v12  ;;  %1056 = vmatpush.bf16.msrb.mxu2 %v945_v38  ;;  %1636 = vmatmul.msk.bf16.gmra.mxu0 %vm291_vm1, %v1828_v62  ;;  %v2554_v52 = vadd.f32 %v1963_v3, %v1961_v40  ;;  %v1965_v15 = vpop.eup %1964 }
 0x123   :  { %1970 = vtanh.f32 %v619_v58  ;;  %1668 = vmatmul.msk.bf16.gmra.mxu1 %vm291_vm1, %v1828_v62  ;;  %v1967_v1 = vpop.eup %1966 }
 0x124   :  { %1972 = vtanh.f32 %v522_v13  ;;  %v907_v35 = vadd.f32 %v1967_v1, %v1965_v15  ;;  %v2600_v62 = vpop.f32.mrf.mxu2  ;;  %v1830_v13 = vld [vmem:[%s3013_s0 + $0x98] sm:$0xff] }
 0x125   :  { %1974 = vtanh.f32 %v691_v4 }
 0x126   :  { %1976 = vtanh.f32 %v515_v9  ;;  %1057 = vmatpush.bf16.msrb.mxu2 %v944_v45 }
 0x127   :  { %1978 = vtanh.f32 %v684_v10  ;;  %v451_v5 = vpop.f32.mrf.mxu0 }
 0x128   :  { %v620_v17 = vpop.f32.mrf.mxu1  ;;  %v1969_v18 = vpop.eup %1968  ;;  %1980 = vtanh.f32 %v517_v27  ;;  %v452_v21 = vadd.f32 %v451_v5, %v2357_v32 }
 0x129   :  { %v621_v6 = vadd.f32 %v620_v17, %v2359_v33  ;;  %v1971_v22 = vpop.eup %1970  ;;  %1982 = vtanh.f32 %v686_v0  ;;  %v2602_v57 = vpop.f32.mrf.mxu3  ;;  %v525_v17 = vadd.f32 %v2514_v49, %v2357_v32 }
 0x12a   :  { %v1973_v23 = vpop.eup %1972  ;;  %1984 = vtanh.f32 %v452_v21  ;;  %1058 = vmatpush.bf16.msrb.mxu2 %v943_v26  ;;  %v2577_v36 = vadd.f32 %v1971_v22, %v1969_v18  ;;  %v694_v21 = vadd.f32 %v2516_v50, %v2359_v33  ;;  %v1831_v50 = vld [vmem:[%s3013_s0 + $0xa0] sm:$0xff] }
 0x12b   :  { %v1975_v44 = vpop.eup %1974  ;;  %1986 = vtanh.f32 %v621_v6 }
 0x12c   :  { %v1977_v45 = vpop.eup %1976  ;;  %v908_v37 = vadd.f32 %v1975_v44, %v1973_v23  ;;  %v2611_v3 = vpop.f32.mrf.mxu2 }
 0x12d   :  { %v1979_v29 = vpop.eup %1978 }
 0x12e   :  { %v1981_v34 = vpop.eup %1980  ;;  %1059 = vmatpush.bf16.msrb.mxu2 %v942_v8  ;;  %v964_v63 = vpack.c.bf16 %v908_v37, %v907_v35  ;;  %v905_v51 = vadd.f32 %v1979_v29, %v1977_v45 }
 0x12f   :  { %v1983_v25 = vpop.eup %1982  ;;  %v454_v26 = vpop.f32.mrf.mxu0 }
 0x130   :  { %v623_v39 = vpop.f32.mrf.mxu1  ;;  %v1985_v41 = vpop.eup %1984  ;;  %v455_v42 = vadd.f32 %v454_v26, %v2357_v32  ;;  %v906_v56 = vadd.f32 %v1983_v25, %v1981_v34 }
 0x131   :  { %v624_v47 = vadd.f32 %v623_v39, %v2359_v33  ;;  %v1987_v48 = vpop.eup %1986  ;;  %v2615_v15 = vpop.f32.mrf.mxu3 }
 0x132   :  { %1988 = vtanh.f32 %v455_v42  ;;  %1060 = vmatpush.bf16.msrb.mxu2 %v941_v55  ;;  %1637 = vmatmul.msk.bf16.gmra.mxu0 %vm291_vm1, %v1829_v16  ;;  %v2595_v7 = vadd.f32 %v1987_v48, %v1985_v41  ;;  %v963_v46 = vpack.c.bf16 %v906_v56, %v905_v51 }
 0x133   :  { %1990 = vtanh.f32 %v624_v47  ;;  %1669 = vmatmul.msk.bf16.gmra.mxu1 %vm291_vm1, %v1829_v16 }
 0x134   :  { %v2629_v29 = vpop.f32.mrf.mxu2 }
 0x136   :  { %1111 = vmatpush.bf16.msra.mxu2 %v964_v63 }
 0x137   :  { %v456_v54 = vpop.f32.mrf.mxu0 }
 0x138   :  { %v625_v55 = vpop.f32.mrf.mxu1  ;;  %v1989_v2 = vpop.eup %1988  ;;  %v457_v38 = vadd.f32 %v456_v54, %v2357_v32  ;;  %v530_v54 = vadd.f32 %v2537_v60, %v2357_v32 }
 0x139   :  { %v626_v40 = vadd.f32 %v625_v55, %v2359_v33  ;;  %v1991_v12 = vpop.eup %1990  ;;  %v2631_v49 = vpop.f32.mrf.mxu3  ;;  %v699_v55 = vadd.f32 %v2539_v61, %v2359_v33 }
 0x13a   :  { %1112 = vmatpush.bf16.msra.mxu2 %v963_v46  ;;  %1992 = vtanh.f32 %v457_v38  ;;  %v2606_v58 = vadd.f32 %v1991_v12, %v1989_v2 }
 0x13b   :  { %1994 = vtanh.f32 %v626_v40 }
 0x13c   :  { %v544_v48 = vpop.f32.mrf.mxu2 }
 0x13f   :  { %v459_v4 = vpop.f32.mrf.mxu0 }
 0x140   :  { %v628_v9 = vpop.f32.mrf.mxu1  ;;  %v1993_v10 = vpop.eup %1992  ;;  %v460_v27 = vadd.f32 %v459_v4, %v2357_v32 }
 0x141   :  { %v629_v0 = vadd.f32 %v628_v9, %v2359_v33  ;;  %v1995_v1 = vpop.eup %1994  ;;  %v713_v51 = vpop.f32.mrf.mxu3 }
 0x142   :  { %1996 = vtanh.f32 %v460_v27  ;;  %1638 = vmatmul.msk.bf16.gmra.mxu0 %vm291_vm1, %v1830_v13  ;;  %v2618_v5 = vadd.f32 %v1995_v1, %v1993_v10  ;;  %v535_v1 = vadd.f32 %v2579_v30, %v2357_v32 }
 0x143   :  { %1998 = vtanh.f32 %v629_v0  ;;  %1670 = vmatmul.msk.bf16.gmra.mxu1 %vm291_vm1, %v1830_v13 }
 0x144   :  { %2000 = vtanh.f32 %v525_v17  ;;  %v2654_v4 = vpop.f32.mrf.mxu2 }
 0x145   :  { %2002 = vtanh.f32 %v694_v21  ;;  %v704_v21 = vadd.f32 %v2581_v31, %v2359_v33  ;;  %v709_v31 = vadd.f32 %v2615_v15, %v2359_v33 }
 0x147   :  { %v461_v6 = vpop.f32.mrf.mxu0 }
 0x148   :  { %v630_v22 = vpop.f32.mrf.mxu1  ;;  %v1997_v23 = vpop.eup %1996  ;;  %v462_v44 = vadd.f32 %v461_v6, %v2357_v32 }
 0x149   :  { %v631_v45 = vadd.f32 %v630_v22, %v2359_v33  ;;  %v1999_v34 = vpop.eup %1998  ;;  %v2656_v9 = vpop.f32.mrf.mxu3 }
 0x14a   :  { %2004 = vtanh.f32 %v462_v44  ;;  %v2633_v35 = vadd.f32 %v1999_v34, %v1997_v23  ;;  %v2001_v37 = vpop.eup %2000 }
 0x14b   :  { %2006 = vtanh.f32 %v631_v45  ;;  %v2003_v16 = vpop.eup %2002 }
 0x14c   :  { %v2646_v46 = vadd.f32 %v2003_v16, %v2001_v37  ;;  %v2668_v17 = vpop.f32.mrf.mxu2  ;;  %v540_v16 = vadd.f32 %v2611_v3, %v2357_v32 }
 0x14f   :  { %v464_v25 = vpop.f32.mrf.mxu0 }
 0x150   :  { %v633_v26 = vpop.f32.mrf.mxu1  ;;  %v2005_v39 = vpop.eup %2004  ;;  %v465_v41 = vadd.f32 %v464_v25, %v2357_v32 }
 0x151   :  { %v634_v42 = vadd.f32 %v633_v26, %v2359_v33  ;;  %v2007_v47 = vpop.eup %2006  ;;  %v2672_v23 = vpop.f32.mrf.mxu3 }
 0x152   :  { %2008 = vtanh.f32 %v465_v41  ;;  %1639 = vmatmul.msk.bf16.gmra.mxu0 %vm291_vm1, %v1831_v50  ;;  %v2641_v63 = vadd.f32 %v2007_v47, %v2005_v39  ;;  %v714_v47 = vadd.f32 %v713_v51, %v2359_v33 }
 0x153   :  { %2010 = vtanh.f32 %v634_v42  ;;  %1671 = vmatmul.msk.bf16.gmra.mxu1 %vm291_vm1, %v1831_v50  ;;  %v545_v42 = vadd.f32 %v544_v48, %v2357_v32 }
 0x154   :  { %2012 = vtanh.f32 %v530_v54 }
 0x155   :  { %2014 = vtanh.f32 %v699_v55 }
 0x156   :  { %2016 = vtanh.f32 %v535_v1 }
 0x157   :  { %v466_v2 = vpop.f32.mrf.mxu0  ;;  %2018 = vtanh.f32 %v704_v21 }
 0x158   :  { %v635_v38 = vpop.f32.mrf.mxu1  ;;  %v2009_v40 = vpop.eup %2008  ;;  %2020 = vtanh.f32 %v540_v16  ;;  %v467_v3 = vadd.f32 %v466_v2, %v2357_v32 }
 0x159   :  { %v2011_v12 = vpop.eup %2010  ;;  %v2676_v50 = vpop.f32.mrf.mxu3  ;;  %2022 = vtanh.f32 %v709_v31  ;;  %v636_v15 = vadd.f32 %v635_v38, %v2359_v33 }
 0x15a   :  { %v2652_v13 = vadd.f32 %v2011_v12, %v2009_v40  ;;  %v2013_v60 = vpop.eup %2012  ;;  %2024 = vtanh.f32 %v545_v42 }
 0x15b   :  { %v2015_v0 = vpop.eup %2014  ;;  %2026 = vtanh.f32 %v714_v47 }
 0x15c   :  { %v2664_v61 = vadd.f32 %v2015_v0, %v2013_v60  ;;  %v2017_v34 = vpop.eup %2016  ;;  %2028 = vtanh.f32 %v467_v3 }
 0x15d   :  { %v2019_v37 = vpop.eup %2018  ;;  %2030 = vtanh.f32 %v636_v15 }
 0x15e   :  { %v2678_v30 = vadd.f32 %v2019_v37, %v2017_v34  ;;  %v2021_v40 = vpop.eup %2020 }
 0x15f   :  { %v2658_v10 = vpop.f32.mrf.mxu0  ;;  %v2023_v12 = vpop.eup %2022 }
 0x160   :  { %v2660_v27 = vpop.f32.mrf.mxu1  ;;  %v2697_v51 = vadd.f32 %v2023_v12, %v2021_v40  ;;  %v2025_v37 = vpop.eup %2024 }
 0x161   :  { %v2686_v41 = vpop.f32.mrf.mxu3  ;;  %v639_v15 = vadd.f32 %v2660_v27, %v2359_v33 }
 0x162   :  { %1640 = vmatmul.msk.bf16.gmra.mxu0 %vm291_vm1, %v2320_v24  ;;  %v2674_v24 = vpop.f32.mrf.mxu2 }
 0x167   :  { %v471_v6 = vpop.f32.mrf.mxu0 }
 0x168   :  { %v640_v22 = vpop.f32.mrf.mxu1 }
 0x169   :  { %v2700_v2 = vpop.f32.mrf.mxu3  ;;  %v641_v40 = vadd.f32 %v640_v22, %v2359_v33 }
 0x16a   :  { %v2684_v39 = vpop.f32.mrf.mxu2 }
 0x16f   :  { %v474_v44 = vpop.f32.mrf.mxu0 }
 0x170   :  { %v643_v45 = vpop.f32.mrf.mxu1  ;;  %v475_v16 = vadd.f32 %v474_v44, %v2357_v32  ;;  %v470_v44 = vadd.f32 %v2658_v10, %v2357_v32 }
 0x171   :  { %v644_v42 = vadd.f32 %v643_v45, %v2359_v33 }
 0x172   :  { %v2695_v48 = vpop.f32.mrf.mxu2 }
 0x177   :  { %v476_v25 = vpop.f32.mrf.mxu0 }
 0x178   :  { %v645_v26 = vpop.f32.mrf.mxu1  ;;  %v477_v60 = vadd.f32 %v476_v25, %v2357_v32 }
 0x179   :  { %v646_v0 = vadd.f32 %v645_v26, %v2359_v33  ;;  %v2027_v26 = vpop.eup %2026 }
 0x17a   :  { %2032 = vtanh.f32 %v477_v60  ;;  %v2029_v47 = vpop.eup %2028  ;;  %v559_v60 = vpop.f32.mrf.mxu2  ;;  %v2714_v28 = vadd.f32 %v2027_v26, %v2025_v37  ;;  %v555_v37 = vadd.f32 %v2684_v39, %v2357_v32 }
 0x17b   :  { %2034 = vtanh.f32 %v646_v0 }
 0x17f   :  { %v479_v54 = vpop.f32.mrf.mxu0 }
 0x180   :  { %v648_v55 = vpop.f32.mrf.mxu1  ;;  %v480_v1 = vadd.f32 %v479_v54, %v2357_v32  ;;  %v472_v54 = vadd.f32 %v471_v6, %v2357_v32 }
 0x181   :  { %v649_v21 = vadd.f32 %v648_v55, %v2359_v33  ;;  %v2031_v55 = vpop.eup %2030 }
 0x182   :  { %2036 = vtanh.f32 %v480_v1  ;;  %v2033_v3 = vpop.eup %2032  ;;  %v561_v26 = vpop.f32.mrf.mxu2 }
 0x183   :  { %2038 = vtanh.f32 %v649_v21  ;;  %v2035_v12 = vpop.eup %2034 }
 0x187   :  { %v481_v38 = vpop.f32.mrf.mxu0 }
 0x188   :  { %v650_v34 = vpop.f32.mrf.mxu1  ;;  %v482_v31 = vadd.f32 %v481_v38, %v2357_v32  ;;  %v2037_v45 = vpop.eup %2036 }
 0x189   :  { %v651_v25 = vadd.f32 %v650_v34, %v2359_v33  ;;  %v2039_v0 = vpop.eup %2038  ;;  %v728_v38 = vpop.f32.mrf.mxu3 }
 0x18a   :  { %2040 = vtanh.f32 %v482_v31  ;;  %v891_v27 = vadd.f32 %v2039_v0, %v2037_v45 }
 0x18b   :  { %2042 = vtanh.f32 %v651_v25 }
 0x18c   :  { %2044 = vtanh.f32 %v475_v16 }
 0x18d   :  { %2046 = vtanh.f32 %v644_v42 }
 0x18e   :  { %2048 = vtanh.f32 %v472_v54 }
 0x18f   :  { %2050 = vtanh.f32 %v641_v40  ;;  %v484_v6 = vpop.f32.mrf.mxu0  ;;  %v890_v40 = vadd.f32 %v2035_v12, %v2033_v3  ;;  %v560_v12 = vadd.f32 %v559_v60, %v2357_v32 }
 0x190   :  { %v653_v1 = vpop.f32.mrf.mxu1  ;;  %v2041_v21 = vpop.eup %2040  ;;  %2052 = vtanh.f32 %v470_v44  ;;  %v485_v22 = vadd.f32 %v484_v6, %v2357_v32 }
 0x191   :  { %v654_v10 = vadd.f32 %v653_v1, %v2359_v33  ;;  %v2043_v34 = vpop.eup %2042  ;;  %2054 = vtanh.f32 %v639_v15  ;;  %v550_v1 = vadd.f32 %v2668_v17, %v2357_v32  ;;  %v730_v17 = vpop.f32.mrf.mxu3 }
 0x192   :  { %v2045_v16 = vpop.eup %2044  ;;  %2056 = vtanh.f32 %v485_v22  ;;  %v892_v31 = vadd.f32 %v2043_v34, %v2041_v21  ;;  %v731_v39 = vadd.f32 %v730_v17, %v2359_v33 }
 0x193   :  { %v2047_v25 = vpop.eup %2046  ;;  %2058 = vtanh.f32 %v654_v10 }
 0x194   :  { %v2049_v42 = vpop.eup %2048  ;;  %v956_v54 = vpack.c.bf16 %v892_v31, %v891_v27  ;;  %v889_v6 = vadd.f32 %v2047_v25, %v2045_v16  ;;  %v729_v27 = vadd.f32 %v728_v38, %v2359_v33  ;;  %v886_v31 = vadd.f32 %v2031_v55, %v2029_v47 }
 0x195   :  { %v2051_v8 = vpop.eup %2050  ;;  %v557_v55 = vadd.f32 %v2695_v48, %v2357_v32 }
 0x196   :  { %v2053_v44 = vpop.eup %2052  ;;  %1082 = vmatpush.bf16.msrb.mxu3 %v956_v54  ;;  %v955_v0 = vpack.c.bf16 %v890_v40, %v889_v6  ;;  %v888_v21 = vadd.f32 %v2051_v8, %v2049_v42  ;;  %v953_v38 = vpack.c.bf16 %v886_v31, %v2652_v13  ;;  %v726_v6 = vadd.f32 %v2700_v2, %v2359_v33  ;;  %v1685_v13 = vld [vmem:[%s3014_s1] sm:$0xf] }
 0x197   :  { %v2055_v18 = vpop.eup %2054  ;;  %v486_v15 = vpop.f32.mrf.mxu0  ;;  %v552_v2 = vadd.f32 %v2674_v24, %v2357_v32  ;;  %v547_v31 = vadd.f32 %v2654_v4, %v2357_v32  ;;  %v1687_v4 = vld [vmem:[%s3014_s1 + $0x10] sm:$0xf0] }
 0x198   :  { %v655_v56 = vpop.f32.mrf.mxu1  ;;  %v2057_v22 = vpop.eup %2056  ;;  %v487_v45 = vadd.f32 %v486_v15, %v2357_v32  ;;  %v887_v34 = vadd.f32 %v2055_v18, %v2053_v44  ;;  %v724_v18 = vadd.f32 %v2686_v41, %v2359_v33  ;;  %v1849_v41 = vld [vmem:[%s3014_s1 + $0xc] sm:$0xf0]  ;;  %v719_v15 = vadd.f32 %v2672_v23, %v2359_v33 }
 0x199   :  { %v656_v10 = vadd.f32 %v655_v56, %v2359_v33  ;;  %v2059_v3 = vpop.eup %2058  ;;  %v562_v56 = vadd.f32 %v561_v26, %v2357_v32  ;;  %v3022_v23 = vpack.c.bf16 %v2641_v63, %v2633_v35 }
 0x19a   :  { %2060 = vtanh.f32 %v487_v45  ;;  %1083 = vmatpush.bf16.msrb.mxu3 %v955_v0  ;;  %v2723_v16 = vadd.f32 %v2059_v3, %v2057_v22  ;;  %v954_v8 = vpack.c.bf16 %v888_v21, %v887_v34  ;;  %v1686_v22 = vor.u32 %v1849_v41, %v1685_v13 }
 0x19b   :  { %2062 = vtanh.f32 %v656_v10  ;;  %v721_v10 = vadd.f32 %v2676_v50, %v2359_v33  ;;  %v537_v41 = vadd.f32 %v2600_v62, %v2357_v32 }
 0x19c   :  { %2064 = vtanh.f32 %v550_v1  ;;  %1061 = vmatmul.bf16.vlgmr.msrb.gmra.mxu2 %v1686_v22 }
 0x19d   :  { %2066 = vtanh.f32 %v555_v37 }
 0x19e   :  { %2068 = vtanh.f32 %v560_v12  ;;  %1084 = vmatpush.bf16.msrb.mxu3 %v954_v8  ;;  %v3023_v8 = vpack.c.bf16 %v2618_v5, %v2606_v58  ;;  %v3024_v58 = vpack.c.bf16 %v2595_v7, %v2577_v36  ;;  %v1847_v5 = vld [vmem:[%s3014_s1 + $0x4] sm:$0xf]  ;;  %v711_v36 = vadd.f32 %v2631_v49, %v2359_v33  ;;  %v1853_v49 = vld [vmem:[%s3014_s1 + $0x2c] sm:$0xf0] }
 0x19f   :  { %2070 = vtanh.f32 %v729_v27  ;;  %v489_v25 = vpop.f32.mrf.mxu0  ;;  %v1690_v13 = vor.u32 %v1847_v5, %v1687_v4 }
 0x1a0   :  { %v2061_v60 = vpop.eup %2060  ;;  %v490_v42 = vadd.f32 %v489_v25, %v2357_v32  ;;  %2072 = vtanh.f32 %v562_v56  ;;  %v658_v54 = vpop.f32.mrf.mxu1 }
 0x1a1   :  { %v2063_v47 = vpop.eup %2062  ;;  %2074 = vtanh.f32 %v731_v39  ;;  %v659_v40 = vadd.f32 %v658_v54, %v2359_v33 }
 0x1a2   :  { %v2735_v44 = vpop.eup %2064  ;;  %2076 = vtanh.f32 %v490_v42  ;;  %1085 = vmatpush.bf16.msrb.mxu3 %v953_v38  ;;  %v2745_v1 = vadd.f32 %v2063_v47, %v2061_v60  ;;  %v716_v60 = vadd.f32 %v2656_v9, %v2359_v33  ;;  %v542_v38 = vadd.f32 %v2629_v29, %v2357_v32 }
 0x1a3   :  { %v2067_v48 = vpop.eup %2066  ;;  %2078 = vtanh.f32 %v659_v40 }
 0x1a4   :  { %v2069_v45 = vpop.eup %2068  ;;  %2080 = vtanh.f32 %v724_v18  ;;  %v957_v0 = vpack.c.bf16 %v2745_v1, %v2723_v16  ;;  %v1860_v1 = vld [vmem:[%s3014_s1 + $0x6c] sm:$0xf] }
 0x1a5   :  { %v2071_v21 = vpop.eup %2070  ;;  %2082 = vtanh.f32 %v557_v55 }
 0x1a6   :  { %v2073_v3 = vpop.eup %2072  ;;  %2084 = vtanh.f32 %v726_v6  ;;  %1086 = vmatpush.bf16.msrb.mxu3 %v3022_v23  ;;  %v923_v56 = vadd.f32 %v2071_v21, %v2069_v45  ;;  %v532_v23 = vadd.f32 %v2565_v11, %v2357_v32  ;;  %v696_v11 = vadd.f32 %v2527_v20, %v2359_v33 }
 0x1a7   :  { %v2075_v37 = vpop.eup %2074  ;;  %2086 = vtanh.f32 %v719_v15  ;;  %v491_v26 = vpop.f32.mrf.mxu0  ;;  %v3025_v15 = vpack.c.bf16 %v2554_v52, %v2531_v43  ;;  %v706_v43 = vadd.f32 %v2602_v57, %v2359_v33  ;;  %v701_v57 = vadd.f32 %v2567_v14, %v2359_v33  ;;  %v1851_v14 = vld [vmem:[%s3014_s1 + $0x24] sm:$0xf] }
 0x1a8   :  { %v2077_v24 = vpop.eup %2076  ;;  %2088 = vtanh.f32 %v552_v2  ;;  %v492_v12 = vadd.f32 %v491_v26, %v2357_v32  ;;  %v660_v34 = vpop.f32.mrf.mxu1  ;;  %v924_v39 = vadd.f32 %v2075_v37, %v2073_v3 }
 0x1a9   :  { %v2079_v17 = vpop.eup %2078  ;;  %2090 = vtanh.f32 %v721_v10  ;;  %v661_v50 = vadd.f32 %v660_v34, %v2359_v33 }
 0x1aa   :  { %v2081_v27 = vpop.eup %2080  ;;  %2092 = vtanh.f32 %v492_v12  ;;  %1087 = vmatpush.bf16.msrb.mxu3 %v3023_v8  ;;  %v2763_v35 = vadd.f32 %v2079_v17, %v2077_v24  ;;  %v972_v47 = vpack.c.bf16 %v924_v39, %v923_v56  ;;  %v527_v17 = vadd.f32 %v2525_v19, %v2357_v32 }
 0x1ab   :  { %v2083_v63 = vpop.eup %2082  ;;  %2094 = vtanh.f32 %v661_v50  ;;  %v921_v55 = vadd.f32 %v2081_v27, %v2067_v48  ;;  %v1701_v48 = vld [vmem:[%s3014_s1 + $0x20] sm:$0xf] }
 0x1ac   :  { %v2085_v25 = vpop.eup %2084  ;;  %2096 = vtanh.f32 %v547_v31  ;;  %v1702_v21 = vor.u32 %v1853_v49, %v1701_v48  ;;  %v1703_v31 = vld [vmem:[%s3014_s1 + $0x30] sm:$0xf0]  ;;  %v1859_v49 = vld [vmem:[%s3014_s1 + $0x64] sm:$0xf] }
 0x1ad   :  { %v2087_v18 = vpop.eup %2086  ;;  %v922_v40 = vadd.f32 %v2085_v25, %v2083_v63  ;;  %2098 = vtanh.f32 %v716_v60  ;;  %v1706_v25 = vor.u32 %v1851_v14, %v1703_v31  ;;  %v1717_v60 = vld [vmem:[%s3014_s1 + $0x40] sm:$0xf] }
 0x1ae   :  { %v2089_v42 = vpop.eup %2088  ;;  %1088 = vmatpush.bf16.msrb.mxu3 %v3024_v58  ;;  %2100 = vtanh.f32 %v542_v38  ;;  %v919_v2 = vadd.f32 %v2087_v18, %v2735_v44  ;;  %1066 = vmatmul.bf16.gmra.mxu2 %v1702_v21  ;;  %v1857_v18 = vld [vmem:[%s3014_s1 + $0x4c] sm:$0xf0] }
 0x1af   :  { %v2091_v54 = vpop.eup %2090  ;;  %v2780_v9 = vpop.f32.mrf.mxu0  ;;  %v971_v45 = vpack.c.bf16 %v922_v40, %v921_v55  ;;  %2102 = vtanh.f32 %v711_v36  ;;  %v1855_v36 = vld [vmem:[%s3014_s1 + $0x44] sm:$0xf] }
 0x1b0   :  { %v2093_v29 = vpop.eup %2092  ;;  %v2784_v7 = vpop.f32.mrf.mxu1  ;;  %v920_v62 = vadd.f32 %v2091_v54, %v2089_v42  ;;  %2104 = vtanh.f32 %v537_v41  ;;  %v1718_v42 = vor.u32 %v1857_v18, %v1717_v60 }
 0x1b1   :  { %v2095_v6 = vpop.eup %2094  ;;  %2106 = vtanh.f32 %v706_v43  ;;  %v681_v43 = vadd.f32 %v2462_v59, %v2359_v33 }
 0x1b2   :  { %1089 = vmatpush.bf16.msrb.mxu3 %v3025_v15  ;;  %v2797_v22 = vadd.f32 %v2095_v6, %v2093_v29  ;;  %v2097_v10 = vpop.eup %2096  ;;  %v970_v44 = vpack.c.bf16 %v920_v62, %v919_v2  ;;  %2108 = vtanh.f32 %v532_v23  ;;  %v679_v62 = vadd.f32 %v2455_v53, %v2359_v33 }
 0x1b3   :  { %v2099_v3 = vpop.eup %2098  ;;  %2110 = vtanh.f32 %v701_v57 }
 0x1b4   :  { %v958_v52 = vpack.c.bf16 %v2797_v22, %v2763_v35  ;;  %v2101_v26 = vpop.eup %2100  ;;  %v918_v24 = vadd.f32 %v2099_v3, %v2097_v10  ;;  %2112 = vtanh.f32 %v527_v17  ;;  %v1856_v35 = vld [vmem:[%s3014_s1 + $0x4c] sm:$0xf]  ;;  %v1727_v22 = vld [vmem:[%s3014_s1 + $0x58] sm:$0xf0] }
 0x1b5   :  { %1090 = vmatmul.bf16.vlgmr.msrb.gmra.mxu3 %v1690_v13  ;;  %v2103_v12 = vpop.eup %2102  ;;  %2114 = vtanh.f32 %v696_v11 }
 0x1b6   :  { %1140 = vmatpush.bf16.msra.mxu3 %v972_v47  ;;  %v2105_v50 = vpop.eup %2104  ;;  %v969_v27 = vpack.c.bf16 %v918_v24, %v2714_v28  ;;  %v916_v8 = vadd.f32 %v2103_v12, %v2101_v26  ;;  %2116 = vtanh.f32 %v679_v62 }
 0x1b7   :  { %v2806_v37 = vpop.f32.mrf.mxu0  ;;  %v2107_v63 = vpop.eup %2106  ;;  %2118 = vtanh.f32 %v681_v43  ;;  %v1858_v43 = vld [vmem:[%s3014_s1 + $0x54] sm:$0xf0] }
 0x1b8   :  { %v2810_v34 = vpop.f32.mrf.mxu1  ;;  %v2109_v56 = vpop.eup %2108  ;;  %v968_v20 = vpack.c.bf16 %v916_v8, %v2697_v51  ;;  %v914_v39 = vadd.f32 %v2107_v63, %v2105_v50  ;;  %v497_v63 = vadd.f32 %v2806_v37, %v2357_v32 }
 0x1b9   :  { %v2111_v28 = vpop.eup %2110  ;;  %v666_v31 = vadd.f32 %v2810_v34, %v2359_v33 }
 0x1ba   :  { %1141 = vmatpush.bf16.msra.mxu3 %v971_v45  ;;  %v2113_v58 = vpop.eup %2112  ;;  %v967_v5 = vpack.c.bf16 %v914_v39, %v2678_v30  ;;  %v912_v4 = vadd.f32 %v2111_v28, %v2109_v56  ;;  %v1719_v30 = vld [vmem:[%s3014_s1 + $0x50] sm:$0xf0]  ;;  %v1848_v56 = vld [vmem:[%s3014_s1 + $0xc] sm:$0xf]  ;;  %v495_v39 = vadd.f32 %v2780_v9, %v2357_v32 }
 0x1bb   :  { %v2115_v51 = vpop.eup %2114  ;;  %v1722_v13 = vor.u32 %v1855_v36, %v1719_v30  ;;  %v1735_v45 = vld [vmem:[%s3014_s1 + $0x70] sm:$0xf0] }
 0x1bc   :  { %v966_v47 = vpack.c.bf16 %v912_v4, %v2664_v61  ;;  %v910_v55 = vadd.f32 %v2115_v51, %v2113_v58  ;;  %v1733_v61 = vld [vmem:[%s3014_s1 + $0x60] sm:$0xf]  ;;  %v1738_v21 = vor.u32 %v1859_v49, %v1735_v45  ;;  %v2117_v17 = vpop.eup %2116  ;;  %v1709_v45 = vld [vmem:[%s3014_s1 + $0x28] sm:$0xf] }
 0x1bd   :  { %v2119_v50 = vpop.eup %2118 }
 0x1be   :  { %1142 = vmatpush.bf16.msra.mxu3 %v970_v44  ;;  %1071 = vmatmul.bf16.gmra.mxu2 %v1718_v42  ;;  %v965_v40 = vpack.c.bf16 %v910_v55, %v2646_v46  ;;  %v1861_v46 = vld [vmem:[%s3014_s1 + $0x6c] sm:$0xf0] }
 0x1bf   :  { %v499_v19 = vpop.f32.mrf.mxu0  ;;  %v1734_v41 = vor.u32 %v1861_v46, %v1733_v61  ;;  %v1711_v61 = vld [vmem:[%s3014_s1 + $0x38] sm:$0xf0] }
 0x1c0   :  { %v668_v38 = vpop.f32.mrf.mxu1  ;;  %v500_v11 = vadd.f32 %v499_v19, %v2357_v32  ;;  %v1695_v19 = vld [vmem:[%s3014_s1 + $0x18] sm:$0xf0] }
 0x1c1   :  { %v1698_v18 = vor.u32 %v1848_v56, %v1695_v19  ;;  %v1870_v56 = vld [vmem:[%s3018_s5 + $0x38] sm:$0xff] }
 0x1c2   :  { %1143 = vmatpush.bf16.msra.mxu3 %v969_v27  ;;  %v669_v27 = vadd.f32 %v668_v38, %v2359_v33 }
 0x1c5   :  { %1095 = vmatmul.bf16.gmra.mxu3 %v1706_v25  ;;  %v664_v25 = vadd.f32 %v2784_v7, %v2359_v33 }
 0x1c6   :  { %1144 = vmatpush.bf16.msra.mxu3 %v968_v20 }
 0x1c7   :  { %v501_v54 = vpop.f32.mrf.mxu0 }
 0x1c8   :  { %v670_v29 = vpop.f32.mrf.mxu1  ;;  %v502_v59 = vadd.f32 %v501_v54, %v2357_v32 }
 0x1c9   :  { %v671_v12 = vadd.f32 %v670_v29, %v2359_v33 }
 0x1ca   :  { %1145 = vmatpush.bf16.msra.mxu3 %v967_v5 }
 0x1ce   :  { %1146 = vmatpush.bf16.msra.mxu3 %v966_v47  ;;  %1076 = vmatmul.bf16.gmra.mxu2 %v1734_v41 }
 0x1cf   :  { %v504_v6 = vpop.f32.mrf.mxu0 }
 0x1d0   :  { %v673_v48 = vpop.f32.mrf.mxu1  ;;  %v505_v26 = vadd.f32 %v504_v6, %v2357_v32 }
 0x1d1   :  { %v674_v53 = vadd.f32 %v673_v48, %v2359_v33  ;;  %v1850_v48 = vld [vmem:[%s3014_s1 + $0x14] sm:$0xf0] }
 0x1d2   :  { %1147 = vmatpush.bf16.msra.mxu3 %v965_v40 }
 0x1d5   :  { %1100 = vmatmul.bf16.gmra.mxu3 %v1722_v13  ;;  %v1852_v13 = vld [vmem:[%s3014_s1 + $0x2c] sm:$0xf] }
 0x1d6   :  { %v1714_v41 = vor.u32 %v1852_v13, %v1711_v61  ;;  %1320 = vmatpush.bf16.msrb.mxu3 %v1870_v56 }
 0x1d7   :  { %v506_v15 = vpop.f32.mrf.mxu0 }
 0x1d8   :  { %v675_v10 = vpop.f32.mrf.mxu1  ;;  %v507_v3 = vadd.f32 %v506_v15, %v2357_v32  ;;  %v1693_v15 = vld [vmem:[%s3014_s1 + $0x8] sm:$0xf] }
 0x1d9   :  { %v676_v44 = vadd.f32 %v675_v10, %v2359_v33  ;;  %v1694_v49 = vor.u32 %v1850_v48, %v1693_v15 }
 0x1da   :  { %2120 = vtanh.f32 %v507_v3 }
 0x1df   :  { %v509_v2 = vpop.f32.mrf.mxu0 }
 0x1e0   :  { %v510_v23 = vadd.f32 %v509_v2, %v2357_v32  ;;  %v2121_v8 = vpop.eup %2120  ;;  %v1854_v2 = vld [vmem:[%s3014_s1 + $0x34] sm:$0xf0] }
 0x1e1   :  { %v1710_v16 = vor.u32 %v1854_v2, %v1709_v45 }
 0x1e2   :  { %2122 = vtanh.f32 %v510_v23  ;;  %v1741_v23 = vld [vmem:[%s3014_s1 + $0x68] sm:$0xf] }
 0x1e3   :  { %2124 = vtanh.f32 %v676_v44  ;;  %v1862_v44 = vld [vmem:[%s3014_s1 + $0x74] sm:$0xf0] }
 0x1e5   :  { %1105 = vmatmul.bf16.gmra.mxu3 %v1738_v21  ;;  %v1725_v21 = vld [vmem:[%s3014_s1 + $0x48] sm:$0xf] }
 0x1e6   :  { %v1726_v10 = vor.u32 %v1858_v43, %v1725_v21 }
 0x1e7   :  { %v511_v57 = vpop.f32.mrf.mxu0 }
 0x1e8   :  { %v512_v24 = vadd.f32 %v511_v57, %v2357_v32  ;;  %v2123_v14 = vpop.eup %2122  ;;  %v1742_v57 = vor.u32 %v1862_v44, %v1741_v23 }
 0x1e9   :  { %v2125_v20 = vpop.eup %2124  ;;  %v903_v28 = vadd.f32 %v2123_v14, %v2117_v17 }
 0x1ea   :  { %2126 = vtanh.f32 %v512_v24  ;;  %v902_v5 = vadd.f32 %v2125_v20, %v2121_v8  ;;  %v1869_v20 = vld [vmem:[%s3018_s5 + $0x30] sm:$0xff] }
 0x1eb   :  { %2128 = vtanh.f32 %v505_v26  ;;  %1321 = vmatpush.bf16.msrb.mxu3 %v1869_v20 }
 0x1ec   :  { %2130 = vtanh.f32 %v674_v53 }
 0x1ed   :  { %2132 = vtanh.f32 %v502_v59 }
 0x1ee   :  { %2134 = vtanh.f32 %v671_v12 }
 0x1ef   :  { %2136 = vtanh.f32 %v500_v11 }
 0x1f0   :  { %v2127_v37 = vpop.eup %2126  ;;  %2138 = vtanh.f32 %v669_v27 }
 0x1f1   :  { %v2129_v34 = vpop.eup %2128  ;;  %2140 = vtanh.f32 %v497_v63  ;;  %v904_v60 = vadd.f32 %v2127_v37, %v2119_v50 }
 0x1f2   :  { %v2131_v42 = vpop.eup %2130  ;;  %2142 = vtanh.f32 %v666_v31 }
 0x1f3   :  { %v2133_v38 = vpop.eup %2132  ;;  %2144 = vtanh.f32 %v495_v39  ;;  %v962_v58 = vpack.c.bf16 %v904_v60, %v903_v28  ;;  %v901_v9 = vadd.f32 %v2131_v42, %v2129_v34  ;;  %v1868_v39 = vld [vmem:[%s3018_s5 + $0x28] sm:$0xff]  ;;  %v1867_v28 = vld [vmem:[%s3018_s5 + $0x20] sm:$0xff]  ;;  %v1866_v60 = vld [vmem:[%s3018_s5 + $0x18] sm:$0xff] }
 0x1f4   :  { %v2135_v4 = vpop.eup %2134  ;;  %2146 = vtanh.f32 %v664_v25  ;;  %1322 = vmatpush.bf16.msrb.mxu3 %v1868_v39  ;;  %v1864_v42 = vld [vmem:[%s3018_s5 + $0x8] sm:$0xff] }
 0x1f5   :  { %v2137_v32 = vpop.eup %2136  ;;  %1113 = vmatpush.bf16.msra.mxu2 %v962_v58  ;;  %1148 = vmatmul.bf16.vlgmr.msra.gmra.mxu3 %v1698_v18  ;;  %v961_v7 = vpack.c.bf16 %v902_v5, %v901_v9  ;;  %v900_v54 = vadd.f32 %v2135_v4, %v2133_v38  ;;  %v1865_v18 = vld [vmem:[%s3018_s5 + $0x10] sm:$0xff]  ;;  %v1863_v38 = vld [vmem:[%s3018_s5] sm:$0xff]  ;;  %v1878_v5 = vld [vmem:[%s3018_s5 + $0x78] sm:$0xff] }
 0x1f6   :  { %v2139_v51 = vpop.eup %2138  ;;  %v1877_v4 = vld [vmem:[%s3018_s5 + $0x70] sm:$0xff]  ;;  %v1876_v9 = vld [vmem:[%s3018_s5 + $0x68] sm:$0xff] }
 0x1f7   :  { %v2141_v33 = vpop.eup %2140  ;;  %v899_v40 = vadd.f32 %v2139_v51, %v2137_v32 }
 0x1f8   :  { %v2143_v47 = vpop.eup %2142  ;;  %1323 = vmatpush.bf16.msrb.mxu3 %v1867_v28 }
 0x1f9   :  { %v2145_v55 = vpop.eup %2144  ;;  %1114 = vmatpush.bf16.msra.mxu2 %v961_v7  ;;  %v960_v36 = vpack.c.bf16 %v900_v54, %v899_v40  ;;  %v898_v30 = vadd.f32 %v2143_v47, %v2141_v33  ;;  %v1875_v33 = vld [vmem:[%s3018_s5 + $0x60] sm:$0xff]  ;;  %v1874_v54 = vld [vmem:[%s3018_s5 + $0x58] sm:$0xff] }
 0x1fa   :  { %v2147_v29 = vpop.eup %2146 }
 0x1fb   :  { %v897_v6 = vadd.f32 %v2147_v29, %v2145_v55  ;;  %v1873_v55 = vld [vmem:[%s3018_s5 + $0x50] sm:$0xff] }
 0x1fc   :  { %1324 = vmatpush.bf16.msrb.mxu3 %v1866_v60 }
 0x1fd   :  { %1115 = vmatpush.bf16.msra.mxu2 %v960_v36  ;;  %v959_v46 = vpack.c.bf16 %v898_v30, %v897_v6  ;;  %v1872_v36 = vld [vmem:[%s3018_s5 + $0x48] sm:$0xff] }
 0x200   :  { %1325 = vmatpush.bf16.msrb.mxu3 %v1865_v18 }
 0x201   :  { %1116 = vmatpush.bf16.msra.mxu2 %v959_v46 }
 0x204   :  { %1326 = vmatpush.bf16.msrb.mxu3 %v1864_v42 }
 0x205   :  { %1117 = vmatpush.bf16.msra.mxu2 %v958_v52  ;;  %1153 = vmatmul.bf16.gmra.mxu3 %v1714_v41  ;;  %v1730_v52 = vor.u32 %v1856_v35, %v1727_v22  ;;  %v1871_v41 = vld [vmem:[%s3018_s5 + $0x40] sm:$0xff] }
 0x208   :  { %1327 = vmatpush.bf16.msrb.mxu3 %v1863_v38 }
 0x209   :  { %1118 = vmatpush.bf16.msra.mxu2 %v957_v0  ;;  %v1743_v0 = vld [vmem:[%s3014_s1 + $0x78] sm:$0xf0] }
 0x20a   :  { %v1746_v62 = vor.u32 %v1860_v1, %v1743_v0 }
 0x20c   :  { %1119 = vmatmul.bf16.vlgmr.msra.gmra.mxu2 %v1694_v49 }
 0x20d   :  { %1253 = vmatpush.bf16.msrb.mxu2 %v1878_v5 }
 0x211   :  { %1254 = vmatpush.bf16.msrb.mxu2 %v1877_v4 }
 0x215   :  { %1158 = vmatmul.bf16.gmra.mxu3 %v1730_v52  ;;  %1255 = vmatpush.bf16.msrb.mxu2 %v1876_v9 }
 0x219   :  { %1256 = vmatpush.bf16.msrb.mxu2 %v1875_v33 }
 0x21c   :  { %1124 = vmatmul.bf16.gmra.mxu2 %v1710_v16 }
 0x21d   :  { %1257 = vmatpush.bf16.msrb.mxu2 %v1874_v54 }
 0x21f   :  { %v1062_v3 = vpop.f32.mrf.mxu2 }
 0x221   :  { %1258 = vmatpush.bf16.msrb.mxu2 %v1873_v55 }
 0x225   :  { %1163 = vmatmul.bf16.gmra.mxu3 %v1746_v62  ;;  %1259 = vmatpush.bf16.msrb.mxu2 %v1872_v36 }
 0x227   :  { %v1064_v26 = vpop.f32.mrf.mxu2 }
 0x229   :  { %1260 = vmatpush.bf16.msrb.mxu2 %v1871_v41 }
 0x22c   :  { %1129 = vmatmul.bf16.gmra.mxu2 %v1726_v10 }
 0x231   :  { %v1067_v12 = vpop.f32.mrf.mxu2 }
 0x238   :  { %v1091_v53 = vpop.f32.mrf.mxu3 }
 0x239   :  { %v1092_v24 = vadd.f32 %v1091_v53, %v1062_v3  ;;  %v1069_v50 = vpop.f32.mrf.mxu2 }
 0x23c   :  { %1134 = vmatmul.bf16.gmra.mxu2 %v1742_v57 }
 0x240   :  { %v1093_v59 = vpop.f32.mrf.mxu3 }
 0x241   :  { %v1072_v8 = vpop.f32.mrf.mxu2  ;;  %v1094_v40 = vadd.f32 %v1093_v59, %v1064_v26 }
 0x248   :  { %v1096_v17 = vpop.f32.mrf.mxu3 }
 0x249   :  { %v1097_v11 = vadd.f32 %v1096_v17, %v1067_v12  ;;  %v2929_v31 = vpop.f32.mrf.mxu2 }
 0x250   :  { %v1098_v27 = vpop.f32.mrf.mxu3 }
 0x251   :  { %v1077_v37 = vpop.f32.mrf.mxu2  ;;  %v1099_v35 = vadd.f32 %v1098_v27, %v1069_v50 }
 0x258   :  { %v1101_v63 = vpop.f32.mrf.mxu3 }
 0x259   :  { %v2927_v14 = vadd.f32 %v1101_v63, %v1072_v8  ;;  %v1079_v51 = vpop.f32.mrf.mxu2 }
 0x260   :  { %v1103_v19 = vpop.f32.mrf.mxu3 }
 0x261   :  { %v1104_v43 = vadd.f32 %v1103_v19, %v2929_v31  ;;  %v1891_v19 = vld [vmem:[%s3019_s6] ss:$0 sm:$0xff] }
 0x268   :  { %v1106_v25 = vpop.f32.mrf.mxu3 }
 0x269   :  { %v2940_v34 = vadd.f32 %v1106_v25, %v1077_v37 }
 0x270   :  { %v1108_v58 = vpop.f32.mrf.mxu3 }
 0x271   :  { %v1109_v59 = vadd.f32 %v1108_v58, %v1079_v51 }
 0x278   :  { %v1149_v32 = vpop.f32.mrf.mxu3 }
 0x280   :  { %v1151_v7 = vpop.f32.mrf.mxu3 }
 0x288   :  { %v1154_v6 = vpop.f32.mrf.mxu3 }
 0x28f   :  { %v1120_v47 = vpop.f32.mrf.mxu2 }
 0x290   :  { %v1121_v29 = vadd.f32 %v1120_v47, %v1092_v24  ;;  %v1156_v49 = vpop.f32.mrf.mxu3 }
 0x292   :  { %v1150_v61 = vadd.f32 %v1149_v32, %v1121_v29 }
 0x297   :  { %v1122_v30 = vpop.f32.mrf.mxu2 }
 0x298   :  { %v1123_v13 = vadd.f32 %v1122_v30, %v1094_v40  ;;  %v1159_v1 = vpop.f32.mrf.mxu3 }
 0x29a   :  { %v1152_v46 = vadd.f32 %v1151_v7, %v1123_v13 }
 0x29c   :  { %v1201_v15 = vpack.c.bf16 %v1152_v46, %v1150_v61 }
 0x29e   :  { %1328 = vmatmul.bf16.vlgmr.msrb.gmra.mxu3 %v1201_v15 }
 0x29f   :  { %v1125_v48 = vpop.f32.mrf.mxu2 }
 0x2a0   :  { %v1126_v22 = vadd.f32 %v1125_v48, %v1097_v11  ;;  %v1161_v21 = vpop.f32.mrf.mxu3 }
 0x2a2   :  { %v1155_v2 = vadd.f32 %v1154_v6, %v1126_v22 }
 0x2a7   :  { %v1127_v52 = vpop.f32.mrf.mxu2 }
 0x2a8   :  { %v1128_v45 = vadd.f32 %v1127_v52, %v1099_v35  ;;  %v1164_v24 = vpop.f32.mrf.mxu3 }
 0x2aa   :  { %v1157_v16 = vadd.f32 %v1156_v49, %v1128_v45 }
 0x2ac   :  { %v1202_v0 = vpack.c.bf16 %v1157_v16, %v1155_v2 }
 0x2ae   :  { %1333 = vmatmul.bf16.gmra.mxu3 %v1202_v0 }
 0x2af   :  { %v1130_v62 = vpop.f32.mrf.mxu2 }
 0x2b0   :  { %v1131_v10 = vadd.f32 %v1130_v62, %v2927_v14  ;;  %v1166_v50 = vpop.f32.mrf.mxu3  ;;  %v1351_v14 = vlaneseq }
 0x2b2   :  { %v1160_v44 = vadd.f32 %v1159_v1, %v1131_v10  ;;  %v1352_v56 = vand.u32 127, %v1351_v14 }
 0x2b4   :  { %vm1353_vm2 = vcmp.lt.s32.totalorder %v1352_v56, 3 }
 0x2b7   :  { %v1132_v3 = vpop.f32.mrf.mxu2 }
 0x2b8   :  { %v1133_v23 = vadd.f32 %v1132_v3, %v1104_v43  ;;  %v1402_v43 = vld [vmem:[%s3015_s2] sm:$0xff] }
 0x2ba   :  { %v1162_v26 = vadd.f32 %v1161_v21, %v1133_v23 }
 0x2bc   :  { %v1203_v57 = vpack.c.bf16 %v1162_v26, %v1160_v44 }
 0x2be   :  { %1261 = vmatmul.bf16.vlgmr.msrb.gmra.mxu2 %v1203_v57  ;;  %v1403_v57 = vld [vmem:[%s3015_s2 + $0x8] sm:$0xff] }
 0x2bf   :  { %v1135_v53 = vpop.f32.mrf.mxu2 }
 0x2c0   :  { %v1136_v12 = vadd.f32 %v1135_v53, %v2940_v34 }
 0x2c2   :  { %v1165_v27 = vadd.f32 %v1164_v24, %v1136_v12 }
 0x2c7   :  { %v1137_v17 = vpop.f32.mrf.mxu2 }
 0x2c8   :  { %v1138_v11 = vadd.f32 %v1137_v17, %v1109_v59 }
 0x2ca   :  { %v1167_v8 = vadd.f32 %v1166_v50, %v1138_v11  ;;  %v1404_v11 = vld [vmem:[%s3015_s2 + $0x10] sm:$0xff] }
 0x2cc   :  { %v1204_v63 = vpack.c.bf16 %v1167_v8, %v1165_v27 }
 0x2ce   :  { %1266 = vmatmul.bf16.gmra.mxu2 %v1204_v63 }
 0x321   :  { %v1329_v31 = vpop.f32.mrf.mxu3 }
 0x329   :  { %v1331_v25 = vpop.f32.mrf.mxu3 }
 0x331   :  { %v1334_v38 = vpop.f32.mrf.mxu3 }
 0x339   :  { %v1336_v51 = vpop.f32.mrf.mxu3 }
 0x341   :  { %v1262_v20 = vpop.f32.mrf.mxu2 }
 0x342   :  { %v1330_v39 = vadd.f32 %v1329_v31, %v1262_v20  ;;  %v1405_v31 = vld [vmem:[%s3015_s2 + $0x18] sm:$0xff]  ;;  %s2216_s2 = smov [#allocation2]  }
 0x343   :  { %s1445_s19 = sshll.u32 %s2216_s2, 4  ;;  %s1446_s19 = int_to_ptr.vmem [resolvable:$true] %s1445_s19 }
 0x344   :  { %v1343_v37 = vadd.f32 %v1891_v19, %v1330_v39 }
 0x346   :  { %v1354_v34 = vsel %vm1353_vm2, %v1343_v37, -1e+30  ;;  %1347 = vst [vmem:[#allocation2] sm:$0xff] %v1343_v37 }
 0x347   :  { %1358 = vmax.xlane.f32.xlu0 %v1354_v34 }
 0x349   :  { %v1264_v28 = vpop.f32.mrf.mxu2 }
 0x34a   :  { %v1332_v60 = vadd.f32 %v1331_v25, %v1264_v28 }
 0x34c   :  { %v1344_v18 = vadd.f32 %v1891_v19, %v1332_v60 }
 0x34e   :  { %1348 = vst [vmem:[#allocation2 + $0x8] sm:$0xff] %v1344_v18  ;;  %v1355_v42 = vsel %vm1353_vm2, %v1344_v18, -1e+30 }
 0x34f   :  { %1360 = vmax.xlane.f32.xlu0 %v1355_v42 }
 0x351   :  { %v1267_v58 = vpop.f32.mrf.mxu2 }
 0x352   :  { %v1335_v5 = vadd.f32 %v1334_v38, %v1267_v58 }
 0x354   :  { %v1345_v4 = vadd.f32 %v1891_v19, %v1335_v5 }
 0x356   :  { %v1356_v32 = vsel %vm1353_vm2, %v1345_v4, -1e+30  ;;  %1349 = vst [vmem:[#allocation2 + $0x10] sm:$0xff] %v1345_v4 }
 0x357   :  { %1362 = vmax.xlane.f32.xlu1 %v1356_v32 }
 0x359   :  { %v1269_v9 = vpop.f32.mrf.mxu2 }
 0x35a   :  { %v1337_v33 = vadd.f32 %v1336_v51, %v1269_v9 }
 0x35c   :  { %v1346_v7 = vadd.f32 %v1891_v19, %v1337_v33 }
 0x35e   :  { %v1357_v54 = vsel %vm1353_vm2, %v1346_v7, -1e+30  ;;  %1350 = vst [vmem:[#allocation2 + $0x18] sm:$0xff] %v1346_v7 }
 0x35f   :  { %1364 = vmax.xlane.f32.xlu1 %v1357_v54  ;;  %1453 = dma.vmem_to_hbm [thread:$0]  %s1446_s19, 512, %s1448_s22, [#allocation3], %s2217_s23, %s2217_s23, %s2218_s24  }
 0x3ba   :  { %v1359_v47 = vpop.xlane.xlu0 %1358 }
 0x3bb   :  { %v1366_v55 = vsub.f32 %v1354_v34, %v1359_v47 }
 0x3bd   :  { %v1370_v40 = vmul.f32 1.442695, %v1366_v55 }
 0x3bf   :  { %2148 = vpow2.f32 %v1370_v40 }
 0x3c2   :  { %v1361_v29 = vpop.xlane.xlu0 %1360 }
 0x3c3   :  { %v1367_v36 = vsub.f32 %v1355_v42, %v1361_v29 }
 0x3c5   :  { %v2149_v30 = vpop.eup %2148  ;;  %v1372_v6 = vmul.f32 1.442695, %v1367_v36 }
 0x3c6   :  { %v1378_v13 = vsel %vm1353_vm2, %v2149_v30, 0.0 }
 0x3c7   :  { %2150 = vpow2.f32 %v1372_v6  ;;  %1382 = vadd.xlane.f32.xlu2 %v1378_v13 }
 0x3ca   :  { %v1363_v61 = vpop.xlane.xlu1 %1362 }
 0x3cb   :  { %v1368_v46 = vsub.f32 %v1356_v32, %v1363_v61 }
 0x3cd   :  { %v2151_v41 = vpop.eup %2150  ;;  %v1374_v15 = vmul.f32 1.442695, %v1368_v46 }
 0x3ce   :  { %v1379_v48 = vsel %vm1353_vm2, %v2151_v41, 0.0 }
 0x3cf   :  { %2152 = vpow2.f32 %v1374_v15  ;;  %1384 = vadd.xlane.f32.xlu2 %v1379_v48 }
 0x3d2   :  { %v1365_v49 = vpop.xlane.xlu1 %1364 }
 0x3d3   :  { %v1369_v35 = vsub.f32 %v1357_v54, %v1365_v49 }
 0x3d5   :  { %v2153_v22 = vpop.eup %2152  ;;  %v1376_v52 = vmul.f32 1.442695, %v1369_v35 }
 0x3d6   :  { %v1380_v45 = vsel %vm1353_vm2, %v2153_v22, 0.0 }
 0x3d7   :  { %2154 = vpow2.f32 %v1376_v52  ;;  %1386 = vadd.xlane.f32.xlu0 %v1380_v45 }
 0x3dd   :  { %v2155_v2 = vpop.eup %2154 }
 0x3de   :  { %v1381_v16 = vsel %vm1353_vm2, %v2155_v2, 0.0 }
 0x3df   :  { %1388 = vadd.xlane.f32.xlu1 %v1381_v16 }
 0x43a   :  { %v1383_v1 = vpop.xlane.xlu2 %1382 }
 0x43b   :  { %2156 = vlog2.f32 %v1383_v1 }
 0x441   :  { %v2157_v0 = vpop.eup %2156 }
 0x442   :  { %v1391_v62 = vmul.f32 0.6931472, %v2157_v0  ;;  %v1385_v21 = vpop.xlane.xlu2 %1384 }
 0x443   :  { %2158 = vlog2.f32 %v1385_v21 }
 0x444   :  { %v1398_v10 = vsub.f32 %v1366_v55, %v1391_v62 }
 0x446   :  { %v1406_v3 = vmul.f32 %v1402_v43, %v1398_v10 }
 0x448   :  { %1410 = vadd.xlane.f32.xlu2 %v1406_v3 }
 0x449   :  { %v2159_v23 = vpop.eup %2158 }
 0x44a   :  { %v1393_v44 = vmul.f32 0.6931472, %v2159_v23  ;;  %v1387_v26 = vpop.xlane.xlu0 %1386 }
 0x44b   :  { %2160 = vlog2.f32 %v1387_v26 }
 0x44c   :  { %v1399_v53 = vsub.f32 %v1367_v36, %v1393_v44 }
 0x44e   :  { %v1407_v24 = vmul.f32 %v1403_v57, %v1399_v53 }
 0x450   :  { %1412 = vadd.xlane.f32.xlu0 %v1407_v24 }
 0x451   :  { %v2161_v59 = vpop.eup %2160 }
 0x452   :  { %v1395_v12 = vmul.f32 0.6931472, %v2161_v59  ;;  %v1389_v17 = vpop.xlane.xlu1 %1388 }
 0x453   :  { %2162 = vlog2.f32 %v1389_v17 }
 0x454   :  { %v1400_v50 = vsub.f32 %v1368_v46, %v1395_v12 }
 0x456   :  { %v1408_v27 = vmul.f32 %v1404_v11, %v1400_v50 }
 0x458   :  { %1414 = vadd.xlane.f32.xlu1 %v1408_v27 }
 0x459   :  { %v2163_v8 = vpop.eup %2162 }
 0x45a   :  { %v1397_v63 = vmul.f32 0.6931472, %v2163_v8 }
 0x45c   :  { %v1401_v14 = vsub.f32 %v1369_v35, %v1397_v63 }
 0x45e   :  { %v1409_v56 = vmul.f32 %v1405_v31, %v1401_v14 }
 0x460   :  { %1416 = vadd.xlane.f32.xlu2 %v1409_v56 }
 0x4bb   :  { %v1411_v20 = vpop.xlane.xlu2 %1410 }
 0x4bc   :  { %v1418_v25 = vsub.f32 0.0, %v1411_v20 }
 0x4be   :  { %v1423_v60 = vsel %vm1422_vm3, %v1418_v25, 0.0 }
 0x4c3   :  { %v1413_v19 = vpop.xlane.xlu0 %1412 }
 0x4c4   :  { %v1419_v37 = vsub.f32 0.0, %v1413_v19 }
 0x4c6   :  { %v1424_v28 = vsel %vm1422_vm3, %v1419_v37, 0.0 }
 0x4c7   :  { %v1425_v42 = vadd.f32 %v1424_v28, %v1423_v60 }
 0x4cb   :  { %v1415_v39 = vpop.xlane.xlu1 %1414 }
 0x4cc   :  { %v1420_v34 = vsub.f32 0.0, %v1415_v39 }
 0x4ce   :  { %v1426_v18 = vsel %vm1422_vm3, %v1420_v34, 0.0 }
 0x4cf   :  { %v1427_v5 = vadd.f32 %v1426_v18, %v1425_v42 }
 0x4d3   :  { %v1417_v38 = vpop.xlane.xlu2 %1416 }
 0x4d4   :  { %v1421_v58 = vsub.f32 0.0, %v1417_v38 }
 0x4d6   :  { %v1428_v4 = vsel %vm1422_vm3, %v1421_v58, 0.0 }
 0x4d7   :  { %v1429_v32 = vadd.f32 %v1428_v4, %v1427_v5 }
 0x4d9   :  { %1430 = vadd.xlane.f32.xlu0 %v1429_v32 }
 0x54c   :  { %v1431_v9 = vpop.xlane.xlu0 %1430 }
 0x54d   :  { %v1432_v51 = vrot.slane %v1431_v9, 4 }
 0x54f   :  { %v1433_v33 = vadd.f32 %v1432_v51, %v1431_v9 }
 0x551   :  { %v1434_v7 = vrot.slane %v1433_v33, 2 }
 0x553   :  { %v1435_v54 = vadd.f32 %v1434_v7, %v1433_v33 }
 0x555   :  { %v1436_v47 = vrot.slane %v1435_v54, 1 }
 0x557   :  { %v1437_v55 = vadd.f32 %v1436_v47, %v1435_v54 }
 0x559   :  { %1885 = vpush %v1437_v55 }
 0x58a   :  { %s1886_s7 = spop %1885 }
 0x58b   :  { %v1439_v40 = vstv %s1886_s7 }
 0x58c   :  { %1440 = vst [vmem:[#allocation4] sm:$0xff] %v1439_v40 }
 0x58d   :  { %1464 = dma.vmem_to_hbm [thread:$0]  %s1460_s25, 128, %s1462_s27, [#allocation5]  }
 0x58e   :  { %2212 = dma.done.wait [#allocation3], 512  }
 0x58f   :  { %2213 = vsyncadd [#allocation3], 4294966784 }
 0x590   :  { %2214 = dma.done.wait [#allocation5], 128  }
 0x591   :  { %2215 = vsyncadd [#allocation5], 4294967168 }
 0x592   :  { %1473 = vsyncpa [#allocation3], 1 }
 0x593   :  { %1474 = vsyncpa [#allocation5], 1 }

</bundles_post_ra>
